<compile_context>
chip_gen: v6e
topology: v6e:2x2x1
jax: 0.10.0
libtpu: 0.0.40
codegen_flags: <defaults>
</compile_context>

<pallas_src>
import functools

import jax
import jax.numpy as jnp
from jax import lax
from jax.experimental import pallas as pl
from jax.experimental.pallas import tpu as pltpu


# ----------------------------- kernel ----------------------------------------


def _layernorm(x, gamma, beta, eps=1e-5):
    mu = jnp.mean(x, axis=-1, keepdims=True)
    var = jnp.mean((x - mu) ** 2, axis=-1, keepdims=True)
    return (x - mu) * lax.rsqrt(var + eps) * gamma + beta


def _tf_embedder_kernel(
    # inputs
    x_ref, emb_w_ref, emb_b_ref,
    wq_ref, bq_ref, wk_ref, bk_ref, wv_ref, bv_ref, wo_ref, bo_ref,
    ln1g_ref, ln1b_ref, w1_ref, b1_ref, w2_ref, b2_ref, ln2g_ref, ln2b_ref,
    fc_w_ref, fc_b_ref,
    # output
    out_ref,
    # scratch (VMEM-resident activation for the whole network)
    h_ref,
    *, num_heads,
):
    layer = pl.program_id(1)

    # ---- first layer step for this batch row: embedding Linear(D_in, H) ----
    @pl.when(layer == 0)
    def _():
        h_ref[...] = (
            jnp.dot(x_ref[0], emb_w_ref[...], preferred_element_type=jnp.float32)
            + emb_b_ref[...]
        )

    h = h_ref[...]                               # [G, H]
    G, H = h.shape
    dh = H // num_heads
    scale = 1.0 / (dh ** 0.5)

    # ---- multi-head self-attention; heads are split on the WEIGHTS host-side
    #      so there is no lane slicing / concatenation of activations here. ----
    attn = jnp.zeros_like(h)
    for hh in range(num_heads):                  # static unroll, num_heads small
        q = jnp.dot(h, wq_ref[0, hh], preferred_element_type=jnp.float32) + bq_ref[0, hh]
        k = jnp.dot(h, wk_ref[0, hh], preferred_element_type=jnp.float32) + bk_ref[0, hh]
        v = jnp.dot(h, wv_ref[0, hh], preferred_element_type=jnp.float32) + bv_ref[0, hh]
        # scores = q @ k.T without an explicit transpose.
        s = lax.dot_general(q, k, (((1,), (1,)), ((), ())),
                            preferred_element_type=jnp.float32) * scale  # [G, G]
        s = s - jnp.max(s, axis=-1, keepdims=True)
        e = jnp.exp(s)
        # approx=False keeps the 1e-4 check tight; flip to approx=True to put
        # the softmax denominator on the EUP estimate path when acceptable.
        p = e * pl.reciprocal(jnp.sum(e, axis=-1, keepdims=True), approx=False)
        av = jnp.dot(p, v, preferred_element_type=jnp.float32)           # [G, dh]
        # accumulate the output projection instead of concatenating heads
        attn = attn + jnp.dot(av, wo_ref[0, hh], preferred_element_type=jnp.float32)
    attn = attn + bo_ref[0]

    y = _layernorm(h + attn, ln1g_ref[0], ln1b_ref[0])                   # post-LN 1

    ff = jnp.maximum(
        jnp.dot(y, w1_ref[0], preferred_element_type=jnp.float32) + b1_ref[0], 0.0)
    ff = jnp.dot(ff, w2_ref[0], preferred_element_type=jnp.float32) + b2_ref[0]
    h_new = _layernorm(y + ff, ln2g_ref[0], ln2b_ref[0])                 # post-LN 2
    h_ref[...] = h_new

    # ---- last layer step: last_fc Linear(H, D_out) + max over G ----
    @pl.when(layer == pl.num_programs(1) - 1)
    def _():
        z = (jnp.dot(h_new, fc_w_ref[...], preferred_element_type=jnp.float32)
             + fc_b_ref[...])                                            # [G, O]
        out_ref[0] = jnp.max(z, axis=0, keepdims=True)                   # [1, O]


# ----------------------------- wrapper ----------------------------------------


def pack_params(params, num_heads):
    """Stack per-layer params along a leading [L] axis and pre-split heads."""
    layers = params["layers"]
    L = len(layers)
    H = params["emb_w"].shape[1]
    dh = H // num_heads

    def stack(name):
        return jnp.stack([lp[name] for lp in layers], axis=0)

    def split_w(w):   # [L, H, H] -> [L, nh, H, dh]  (head = output-column block)
        return w.reshape(L, H, num_heads, dh).transpose(0, 2, 1, 3)

    def split_b(b):   # [L, 1, H] -> [L, nh, 1, dh]
        return b.reshape(L, num_heads, 1, dh)

    return dict(
        emb_w=params["emb_w"], emb_b=params["emb_b"],
        fc_w=params["fc_w"], fc_b=params["fc_b"],
        wq=split_w(stack("wq")), bq=split_b(stack("bq")),
        wk=split_w(stack("wk")), bk=split_b(stack("bk")),
        wv=split_w(stack("wv")), bv=split_b(stack("bv")),
        wo=stack("wo").reshape(L, num_heads, dh, H),   # head = input-row block
        bo=stack("bo"),
        ln1_g=stack("ln1_g"), ln1_b=stack("ln1_b"),
        w1=stack("w1"), b1=stack("b1"),
        w2=stack("w2"), b2=stack("b2"),
        ln2_g=stack("ln2_g"), ln2_b=stack("ln2_b"),
    )


def tf_embedder_forward(x, params, num_heads):
    """x: [B, G, D_in] -> out: [B, D_out]; entire forward in ONE pallas_call."""
    B, G, D_in = x.shape
    H = params["emb_w"].shape[1]
    O = params["fc_w"].shape[1]
    L = len(params["layers"])
    assert H % num_heads == 0, (H, num_heads)
    assert L >= 1

    p = pack_params(params, num_heads)

    def const_spec(arr):          # fetched once, shared across all grid steps
        nd = arr.ndim
        return pl.BlockSpec(arr.shape, lambda b, l, _nd=nd: (0,) * _nd)

    def layer_spec(arr):          # stacked [L, ...], indexed by the layer axis
        nd = arr.ndim
        return pl.BlockSpec((1,) + arr.shape[1:],
                            lambda b, l, _nd=nd: (l,) + (0,) * (_nd - 1))

    names = ["emb_w", "emb_b", "wq", "bq", "wk", "bk", "wv", "bv", "wo", "bo",
             "ln1_g", "ln1_b", "w1", "b1", "w2", "b2", "ln2_g", "ln2_b",
             "fc_w", "fc_b"]
    const_names = {"emb_w", "emb_b", "fc_w", "fc_b"}
    weights = tuple(p[n] for n in names)
    weight_specs = [const_spec(p[n]) if n in const_names else layer_spec(p[n])
                    for n in names]

    out = pl.pallas_call(
        functools.partial(_tf_embedder_kernel, num_heads=num_heads),
        out_shape=jax.ShapeDtypeStruct((B, 1, O), jnp.float32),
        grid=(B, L),
        in_specs=[pl.BlockSpec((1, G, D_in), lambda b, l: (b, 0, 0))] + weight_specs,
        out_specs=pl.BlockSpec((1, 1, O), lambda b, l: (b, 0, 0)),
        scratch_shapes=[pltpu.VMEM((G, H), jnp.float32)],
        compiler_params=pltpu.CompilerParams(
            dimension_semantics=("parallel", "arbitrary"),
        ),
    )(x, *weights)
    return out[:, 0, :]


# ------------------------- plain-JAX reference --------------------------------


def reference_forward(x, params, num_heads):
    h = x @ params["emb_w"] + params["emb_b"]
    for lp in params["layers"]:
        H = h.shape[-1]
        dh = H // num_heads
        q = h @ lp["wq"] + lp["bq"]
        k = h @ lp["wk"] + lp["bk"]
        v = h @ lp["wv"] + lp["bv"]
        outs = []
        for hd in range(num_heads):
            sl = slice(hd * dh, (hd + 1) * dh)
            s = jnp.einsum("bgd,bkd->bgk", q[..., sl], k[..., sl]) / jnp.sqrt(
                jnp.float32(dh)
            )
            a = jax.nn.softmax(s, axis=-1)
            outs.append(jnp.einsum("bgk,bkd->bgd", a, v[..., sl]))
        attn = jnp.concatenate(outs, axis=-1) @ lp["wo"] + lp["bo"]

        def ln(z, g, b):
            mu = jnp.mean(z, -1, keepdims=True)
            var = jnp.mean((z - mu) ** 2, -1, keepdims=True)
            return (z - mu) * lax.rsqrt(var + 1e-5) * g + b

        y = ln(h + attn, lp["ln1_g"], lp["ln1_b"])
        ff = jnp.maximum(y @ lp["w1"] + lp["b1"], 0.0) @ lp["w2"] + lp["b2"]
        h = ln(y + ff, lp["ln2_g"], lp["ln2_b"])
    z = h @ params["fc_w"] + params["fc_b"]
    return jnp.max(z, axis=1)


# ----------------------------- parameters -------------------------------------


def init_params(key, dim_in, dim_h, dim_out, num_layers, dim_ff):
    def dense(k, fan_in, fan_out):
        kw, kb = jax.random.split(k)
        w = jax.random.normal(kw, (fan_in, fan_out), jnp.float32) / jnp.sqrt(
            jnp.float32(fan_in)
        )
        b = 0.01 * jax.random.normal(kb, (1, fan_out), jnp.float32)
        return w, b

    keys = jax.random.split(key, 2 + num_layers)
    params = {}
    params["emb_w"], params["emb_b"] = dense(keys[0], dim_in, dim_h)
    params["fc_w"], params["fc_b"] = dense(keys[1], dim_h, dim_out)
    layers = []
    for li in range(num_layers):
        lk = jax.random.split(keys[2 + li], 6)
        wq, bq = dense(lk[0], dim_h, dim_h)
        wk, bk = dense(lk[1], dim_h, dim_h)
        wv, bv = dense(lk[2], dim_h, dim_h)
        wo, bo = dense(lk[3], dim_h, dim_h)
        w1, b1 = dense(lk[4], dim_h, dim_ff)
        w2, b2 = dense(lk[5], dim_ff, dim_h)
        layers.append(
            dict(
                wq=wq, bq=bq, wk=wk, bk=bk, wv=wv, bv=bv, wo=wo, bo=bo,
                ln1_g=jnp.ones((1, dim_h), jnp.float32),
                ln1_b=jnp.zeros((1, dim_h), jnp.float32),
                w1=w1, b1=b1, w2=w2, b2=b2,
                ln2_g=jnp.ones((1, dim_h), jnp.float32),
                ln2_b=jnp.zeros((1, dim_h), jnp.float32),
            )
        )
    params["layers"] = layers
    return params


# ------------------------------- main ------------------------------------------


if __name__ == "__main__":
    B, G = 2, 8
    dim_in, dim_h, dim_out = 4, 32, 16
    num_heads, num_layers = 4, 2
    dim_ff = 4 * dim_h

    key = jax.random.PRNGKey(0)
    kx, kp = jax.random.split(key)
    x = jax.random.normal(kx, (B, G, dim_in), jnp.float32)
    params = init_params(kp, dim_in, dim_h, dim_out, num_layers, dim_ff)

    out = tf_embedder_forward(x, params, num_heads)
    out = jax.block_until_ready(out)
    assert out.shape == (B, dim_out), out.shape

    ref = reference_forward(x, params, num_heads)
    assert jnp.allclose(out, ref, rtol=1e-4, atol=1e-4), (
        float(jnp.max(jnp.abs(out - ref)))
    )

    print("KERNEL_OK")
</pallas_src>

<mosaic_0001>
module attributes {stable_mosaic.version = 11 : i64} {
  func.func @_tf_embedder_kernel(%arg0: i32, %arg1: i32, %arg2: memref<1x8x4xf32, #tpu.memory_space<vmem>>, %arg3: memref<4x32xf32, #tpu.memory_space<vmem>>, %arg4: memref<1x32xf32, #tpu.memory_space<vmem>>, %arg5: memref<1x4x32x8xf32, #tpu.memory_space<vmem>>, %arg6: memref<1x4x1x8xf32, #tpu.memory_space<vmem>>, %arg7: memref<1x4x32x8xf32, #tpu.memory_space<vmem>>, %arg8: memref<1x4x1x8xf32, #tpu.memory_space<vmem>>, %arg9: memref<1x4x32x8xf32, #tpu.memory_space<vmem>>, %arg10: memref<1x4x1x8xf32, #tpu.memory_space<vmem>>, %arg11: memref<1x4x8x32xf32, #tpu.memory_space<vmem>>, %arg12: memref<1x1x32xf32, #tpu.memory_space<vmem>>, %arg13: memref<1x1x32xf32, #tpu.memory_space<vmem>>, %arg14: memref<1x1x32xf32, #tpu.memory_space<vmem>>, %arg15: memref<1x32x128xf32, #tpu.memory_space<vmem>>, %arg16: memref<1x1x128xf32, #tpu.memory_space<vmem>>, %arg17: memref<1x128x32xf32, #tpu.memory_space<vmem>>, %arg18: memref<1x1x32xf32, #tpu.memory_space<vmem>>, %arg19: memref<1x1x32xf32, #tpu.memory_space<vmem>>, %arg20: memref<1x1x32xf32, #tpu.memory_space<vmem>>, %arg21: memref<32x16xf32, #tpu.memory_space<vmem>>, %arg22: memref<1x16xf32, #tpu.memory_space<vmem>>, %arg23: memref<1x1x16xf32, #tpu.memory_space<vmem>>, %arg24: memref<8x32xf32, #tpu.memory_space<vmem>>) attributes {dimension_semantics = [#tpu.dimension_semantics<parallel>, #tpu.dimension_semantics<arbitrary>], iteration_bounds = array<i64: 2, 2>, scalar_prefetch = 0 : i64, scratch_operands = 1 : i64, tpu.core_type = #tpu.core_type<tc>, window_params = [{transform_indices = @transform_0, window_bounds = array<i64: 1, 8, 4>}, {pipeline_mode = #tpu.pipeline_mode<synchronous>, transform_indices = @transform_1, window_bounds = array<i64: 4, 32>}, {pipeline_mode = #tpu.pipeline_mode<synchronous>, transform_indices = @transform_2, window_bounds = array<i64: 1, 32>}, {transform_indices = @transform_3, window_bounds = array<i64: 1, 4, 32, 8>}, {transform_indices = @transform_4, window_bounds = array<i64: 1, 4, 1, 8>}, {transform_indices = @transform_5, window_bounds = array<i64: 1, 4, 32, 8>}, {transform_indices = @transform_6, window_bounds = array<i64: 1, 4, 1, 8>}, {transform_indices = @transform_7, window_bounds = array<i64: 1, 4, 32, 8>}, {transform_indices = @transform_8, window_bounds = array<i64: 1, 4, 1, 8>}, {transform_indices = @transform_9, window_bounds = array<i64: 1, 4, 8, 32>}, {transform_indices = @transform_10, window_bounds = array<i64: 1, 1, 32>}, {transform_indices = @transform_11, window_bounds = array<i64: 1, 1, 32>}, {transform_indices = @transform_12, window_bounds = array<i64: 1, 1, 32>}, {transform_indices = @transform_13, window_bounds = array<i64: 1, 32, 128>}, {transform_indices = @transform_14, window_bounds = array<i64: 1, 1, 128>}, {transform_indices = @transform_15, window_bounds = array<i64: 1, 128, 32>}, {transform_indices = @transform_16, window_bounds = array<i64: 1, 1, 32>}, {transform_indices = @transform_17, window_bounds = array<i64: 1, 1, 32>}, {transform_indices = @transform_18, window_bounds = array<i64: 1, 1, 32>}, {pipeline_mode = #tpu.pipeline_mode<synchronous>, transform_indices = @transform_19, window_bounds = array<i64: 32, 16>}, {pipeline_mode = #tpu.pipeline_mode<synchronous>, transform_indices = @transform_20, window_bounds = array<i64: 1, 16>}, {transform_indices = @transform_21, window_bounds = array<i64: 1, 1, 16>}]} {
    %c0_i32 = arith.constant 0 : i32
    %0 = arith.cmpi eq, %arg1, %c0_i32 : i32
    %1 = arith.extui %0 : i1 to i32
    %c0_i32_0 = arith.constant 0 : i32
    %2 = arith.cmpi ne, %1, %c0_i32_0 : i32
    scf.if %2 {
      %c0_190 = arith.constant 0 : index
      %c0_191 = arith.constant 0 : index
      %c0_192 = arith.constant 0 : index
      %239 = vector.load %arg2[%c0_190, %c0_191, %c0_192] : memref<1x8x4xf32, #tpu.memory_space<vmem>>, vector<1x8x4xf32>
      %240 = vector.shape_cast %239 : vector<1x8x4xf32> to vector<8x4xf32>
      %c0_193 = arith.constant 0 : index
      %c0_194 = arith.constant 0 : index
      %241 = vector.load %arg3[%c0_193, %c0_194] : memref<4x32xf32, #tpu.memory_space<vmem>>, vector<4x32xf32>
      %cst_195 = arith.constant dense<0.000000e+00> : vector<8x32xf32>
      %242 = tpu.matmul %240, %241, %cst_195 {dimension_numbers = #tpu.dot_dimension_numbers<[1], [0], [0], [1], [0, 0, 1, 1], [], []>} : vector<8x4xf32>, vector<4x32xf32>, vector<8x32xf32> -> vector<8x32xf32>
      %c0_196 = arith.constant 0 : index
      %c0_197 = arith.constant 0 : index
      %243 = vector.load %arg4[%c0_196, %c0_197] : memref<1x32xf32, #tpu.memory_space<vmem>>, vector<1x32xf32>
      %244 = vector.broadcast %243 : vector<1x32xf32> to vector<8x32xf32>
      %245 = arith.addf %242, %244 : vector<8x32xf32>
      %c0_198 = arith.constant 0 : index
      %c0_199 = arith.constant 0 : index
      %246 = vector.load %arg24[%c0_198, %c0_199] : memref<8x32xf32, #tpu.memory_space<vmem>>, vector<8x32xf32>
      tpu.vector_store %arg24[%c0_198, %c0_199], %245 {strides = array<i32>} : memref<8x32xf32, #tpu.memory_space<vmem>>, vector<8x32xf32>,
    } else {
    }
    %c0 = arith.constant 0 : index
    %c0_1 = arith.constant 0 : index
    %3 = vector.load %arg24[%c0, %c0_1] : memref<8x32xf32, #tpu.memory_space<vmem>>, vector<8x32xf32>
    %cst = arith.constant 0.000000e+00 : f32
    %4 = vector.broadcast %cst : f32 to vector<8x32xf32>
    %c0_2 = arith.constant 0 : index
    %c0_3 = arith.constant 0 : index
    %c0_4 = arith.constant 0 : index
    %c0_5 = arith.constant 0 : index
    %5 = vector.load %arg5[%c0_2, %c0_3, %c0_4, %c0_5] : memref<1x4x32x8xf32, #tpu.memory_space<vmem>>, vector<1x1x32x8xf32>
    %6 = vector.shape_cast %5 : vector<1x1x32x8xf32> to vector<32x8xf32>
    %cst_6 = arith.constant dense<0.000000e+00> : vector<8x8xf32>
    %7 = tpu.matmul %3, %6, %cst_6 {dimension_numbers = #tpu.dot_dimension_numbers<[1], [0], [0], [1], [0, 0, 1, 1], [], []>} : vector<8x32xf32>, vector<32x8xf32>, vector<8x8xf32> -> vector<8x8xf32>
    %c0_7 = arith.constant 0 : index
    %c0_8 = arith.constant 0 : index
    %c0_9 = arith.constant 0 : index
    %c0_10 = arith.constant 0 : index
    %8 = vector.load %arg6[%c0_7, %c0_8, %c0_9, %c0_10] : memref<1x4x1x8xf32, #tpu.memory_space<vmem>>, vector<1x1x1x8xf32>
    %9 = vector.shape_cast %8 : vector<1x1x1x8xf32> to vector<1x8xf32>
    %10 = vector.broadcast %9 : vector<1x8xf32> to vector<8x8xf32>
    %11 = arith.addf %7, %10 : vector<8x8xf32>
    %c0_11 = arith.constant 0 : index
    %c0_12 = arith.constant 0 : index
    %c0_13 = arith.constant 0 : index
    %c0_14 = arith.constant 0 : index
    %12 = vector.load %arg7[%c0_11, %c0_12, %c0_13, %c0_14] : memref<1x4x32x8xf32, #tpu.memory_space<vmem>>, vector<1x1x32x8xf32>
    %13 = vector.shape_cast %12 : vector<1x1x32x8xf32> to vector<32x8xf32>
    %cst_15 = arith.constant dense<0.000000e+00> : vector<8x8xf32>
    %14 = tpu.matmul %3, %13, %cst_15 {dimension_numbers = #tpu.dot_dimension_numbers<[1], [0], [0], [1], [0, 0, 1, 1], [], []>} : vector<8x32xf32>, vector<32x8xf32>, vector<8x8xf32> -> vector<8x8xf32>
    %c0_16 = arith.constant 0 : index
    %c0_17 = arith.constant 0 : index
    %c0_18 = arith.constant 0 : index
    %c0_19 = arith.constant 0 : index
    %15 = vector.load %arg8[%c0_16, %c0_17, %c0_18, %c0_19] : memref<1x4x1x8xf32, #tpu.memory_space<vmem>>, vector<1x1x1x8xf32>
    %16 = vector.shape_cast %15 : vector<1x1x1x8xf32> to vector<1x8xf32>
    %17 = vector.broadcast %16 : vector<1x8xf32> to vector<8x8xf32>
    %18 = arith.addf %14, %17 : vector<8x8xf32>
    %c0_20 = arith.constant 0 : index
    %c0_21 = arith.constant 0 : index
    %c0_22 = arith.constant 0 : index
    %c0_23 = arith.constant 0 : index
    %19 = vector.load %arg9[%c0_20, %c0_21, %c0_22, %c0_23] : memref<1x4x32x8xf32, #tpu.memory_space<vmem>>, vector<1x1x32x8xf32>
    %20 = vector.shape_cast %19 : vector<1x1x32x8xf32> to vector<32x8xf32>
    %cst_24 = arith.constant dense<0.000000e+00> : vector<8x8xf32>
    %21 = tpu.matmul %3, %20, %cst_24 {dimension_numbers = #tpu.dot_dimension_numbers<[1], [0], [0], [1], [0, 0, 1, 1], [], []>} : vector<8x32xf32>, vector<32x8xf32>, vector<8x8xf32> -> vector<8x8xf32>
    %c0_25 = arith.constant 0 : index
    %c0_26 = arith.constant 0 : index
    %c0_27 = arith.constant 0 : index
    %c0_28 = arith.constant 0 : index
    %22 = vector.load %arg10[%c0_25, %c0_26, %c0_27, %c0_28] : memref<1x4x1x8xf32, #tpu.memory_space<vmem>>, vector<1x1x1x8xf32>
    %23 = vector.shape_cast %22 : vector<1x1x1x8xf32> to vector<1x8xf32>
    %24 = vector.broadcast %23 : vector<1x8xf32> to vector<8x8xf32>
    %25 = arith.addf %21, %24 : vector<8x8xf32>
    %cst_29 = arith.constant dense<0.000000e+00> : vector<8x8xf32>
    %26 = tpu.matmul %11, %18, %cst_29 {dimension_numbers = #tpu.dot_dimension_numbers<[1], [1], [0], [0], [0, 0, 1, 0], [], []>} : vector<8x8xf32>, vector<8x8xf32>, vector<8x8xf32> -> vector<8x8xf32>
    %cst_30 = arith.constant 0.353553385 : f32
    %27 = vector.broadcast %cst_30 : f32 to vector<8x8xf32>
    %28 = arith.mulf %26, %27 : vector<8x8xf32>
    %cst_31 = arith.constant dense<0xFF800000> : vector<8xf32>
    %29 = vector.multi_reduction <maximumf>, %28, %cst_31 [1] : vector<8x8xf32> to vector<8xf32>
    %30 = vector.shape_cast %29 : vector<8xf32> to vector<8x1xf32>
    %31 = vector.broadcast %30 : vector<8x1xf32> to vector<8x8xf32>
    %32 = arith.subf %28, %31 : vector<8x8xf32>
    %33 = math.exp %32 : vector<8x8xf32>
    %cst_32 = arith.constant dense<0.000000e+00> : vector<8xf32>
    %34 = vector.multi_reduction <add>, %33, %cst_32 [1] : vector<8x8xf32> to vector<8xf32>
    %35 = vector.shape_cast %34 : vector<8xf32> to vector<8x1xf32>
    %36 = tpu.reciprocal %35 : vector<8x1xf32> -> vector<8x1xf32>
    %37 = vector.broadcast %36 : vector<8x1xf32> to vector<8x8xf32>
    %38 = arith.mulf %33, %37 : vector<8x8xf32>
    %cst_33 = arith.constant dense<0.000000e+00> : vector<8x8xf32>
    %39 = tpu.matmul %38, %25, %cst_33 {dimension_numbers = #tpu.dot_dimension_numbers<[1], [0], [0], [1], [0, 0, 1, 1], [], []>} : vector<8x8xf32>, vector<8x8xf32>, vector<8x8xf32> -> vector<8x8xf32>
    %c0_34 = arith.constant 0 : index
    %c0_35 = arith.constant 0 : index
    %c0_36 = arith.constant 0 : index
    %c0_37 = arith.constant 0 : index
    %40 = vector.load %arg11[%c0_34, %c0_35, %c0_36, %c0_37] : memref<1x4x8x32xf32, #tpu.memory_space<vmem>>, vector<1x1x8x32xf32>
    %41 = vector.shape_cast %40 : vector<1x1x8x32xf32> to vector<8x32xf32>
    %cst_38 = arith.constant dense<0.000000e+00> : vector<8x32xf32>
    %42 = tpu.matmul %39, %41, %cst_38 {dimension_numbers = #tpu.dot_dimension_numbers<[1], [0], [0], [1], [0, 0, 1, 1], [], []>} : vector<8x8xf32>, vector<8x32xf32>, vector<8x32xf32> -> vector<8x32xf32>
    %43 = arith.addf %4, %42 : vector<8x32xf32>
    %c0_39 = arith.constant 0 : index
    %c1 = arith.constant 1 : index
    %c0_40 = arith.constant 0 : index
    %c0_41 = arith.constant 0 : index
    %44 = vector.load %arg5[%c0_39, %c1, %c0_40, %c0_41] : memref<1x4x32x8xf32, #tpu.memory_space<vmem>>, vector<1x1x32x8xf32>
    %45 = vector.shape_cast %44 : vector<1x1x32x8xf32> to vector<32x8xf32>
    %cst_42 = arith.constant dense<0.000000e+00> : vector<8x8xf32>
    %46 = tpu.matmul %3, %45, %cst_42 {dimension_numbers = #tpu.dot_dimension_numbers<[1], [0], [0], [1], [0, 0, 1, 1], [], []>} : vector<8x32xf32>, vector<32x8xf32>, vector<8x8xf32> -> vector<8x8xf32>
    %c0_43 = arith.constant 0 : index
    %c1_44 = arith.constant 1 : index
    %c0_45 = arith.constant 0 : index
    %c0_46 = arith.constant 0 : index
    %47 = vector.load %arg6[%c0_43, %c1_44, %c0_45, %c0_46] : memref<1x4x1x8xf32, #tpu.memory_space<vmem>>, vector<1x1x1x8xf32>
    %48 = vector.shape_cast %47 : vector<1x1x1x8xf32> to vector<1x8xf32>
    %49 = vector.broadcast %48 : vector<1x8xf32> to vector<8x8xf32>
    %50 = arith.addf %46, %49 : vector<8x8xf32>
    %c0_47 = arith.constant 0 : index
    %c1_48 = arith.constant 1 : index
    %c0_49 = arith.constant 0 : index
    %c0_50 = arith.constant 0 : index
    %51 = vector.load %arg7[%c0_47, %c1_48, %c0_49, %c0_50] : memref<1x4x32x8xf32, #tpu.memory_space<vmem>>, vector<1x1x32x8xf32>
    %52 = vector.shape_cast %51 : vector<1x1x32x8xf32> to vector<32x8xf32>
    %cst_51 = arith.constant dense<0.000000e+00> : vector<8x8xf32>
    %53 = tpu.matmul %3, %52, %cst_51 {dimension_numbers = #tpu.dot_dimension_numbers<[1], [0], [0], [1], [0, 0, 1, 1], [], []>} : vector<8x32xf32>, vector<32x8xf32>, vector<8x8xf32> -> vector<8x8xf32>
    %c0_52 = arith.constant 0 : index
    %c1_53 = arith.constant 1 : index
    %c0_54 = arith.constant 0 : index
    %c0_55 = arith.constant 0 : index
    %54 = vector.load %arg8[%c0_52, %c1_53, %c0_54, %c0_55] : memref<1x4x1x8xf32, #tpu.memory_space<vmem>>, vector<1x1x1x8xf32>
    %55 = vector.shape_cast %54 : vector<1x1x1x8xf32> to vector<1x8xf32>
    %56 = vector.broadcast %55 : vector<1x8xf32> to vector<8x8xf32>
    %57 = arith.addf %53, %56 : vector<8x8xf32>
    %c0_56 = arith.constant 0 : index
    %c1_57 = arith.constant 1 : index
    %c0_58 = arith.constant 0 : index
    %c0_59 = arith.constant 0 : index
    %58 = vector.load %arg9[%c0_56, %c1_57, %c0_58, %c0_59] : memref<1x4x32x8xf32, #tpu.memory_space<vmem>>, vector<1x1x32x8xf32>
    %59 = vector.shape_cast %58 : vector<1x1x32x8xf32> to vector<32x8xf32>
    %cst_60 = arith.constant dense<0.000000e+00> : vector<8x8xf32>
    %60 = tpu.matmul %3, %59, %cst_60 {dimension_numbers = #tpu.dot_dimension_numbers<[1], [0], [0], [1], [0, 0, 1, 1], [], []>} : vector<8x32xf32>, vector<32x8xf32>, vector<8x8xf32> -> vector<8x8xf32>
    %c0_61 = arith.constant 0 : index
    %c1_62 = arith.constant 1 : index
    %c0_63 = arith.constant 0 : index
    %c0_64 = arith.constant 0 : index
    %61 = vector.load %arg10[%c0_61, %c1_62, %c0_63, %c0_64] : memref<1x4x1x8xf32, #tpu.memory_space<vmem>>, vector<1x1x1x8xf32>
    %62 = vector.shape_cast %61 : vector<1x1x1x8xf32> to vector<1x8xf32>
    %63 = vector.broadcast %62 : vector<1x8xf32> to vector<8x8xf32>
    %64 = arith.addf %60, %63 : vector<8x8xf32>
    %cst_65 = arith.constant dense<0.000000e+00> : vector<8x8xf32>
    %65 = tpu.matmul %50, %57, %cst_65 {dimension_numbers = #tpu.dot_dimension_numbers<[1], [1], [0], [0], [0, 0, 1, 0], [], []>} : vector<8x8xf32>, vector<8x8xf32>, vector<8x8xf32> -> vector<8x8xf32>
    %cst_66 = arith.constant 0.353553385 : f32
    %66 = vector.broadcast %cst_66 : f32 to vector<8x8xf32>
    %67 = arith.mulf %65, %66 : vector<8x8xf32>
    %cst_67 = arith.constant dense<0xFF800000> : vector<8xf32>
    %68 = vector.multi_reduction <maximumf>, %67, %cst_67 [1] : vector<8x8xf32> to vector<8xf32>
    %69 = vector.shape_cast %68 : vector<8xf32> to vector<8x1xf32>
    %70 = vector.broadcast %69 : vector<8x1xf32> to vector<8x8xf32>
    %71 = arith.subf %67, %70 : vector<8x8xf32>
    %72 = math.exp %71 : vector<8x8xf32>
    %cst_68 = arith.constant dense<0.000000e+00> : vector<8xf32>
    %73 = vector.multi_reduction <add>, %72, %cst_68 [1] : vector<8x8xf32> to vector<8xf32>
    %74 = vector.shape_cast %73 : vector<8xf32> to vector<8x1xf32>
    %75 = tpu.reciprocal %74 : vector<8x1xf32> -> vector<8x1xf32>
    %76 = vector.broadcast %75 : vector<8x1xf32> to vector<8x8xf32>
    %77 = arith.mulf %72, %76 : vector<8x8xf32>
    %cst_69 = arith.constant dense<0.000000e+00> : vector<8x8xf32>
    %78 = tpu.matmul %77, %64, %cst_69 {dimension_numbers = #tpu.dot_dimension_numbers<[1], [0], [0], [1], [0, 0, 1, 1], [], []>} : vector<8x8xf32>, vector<8x8xf32>, vector<8x8xf32> -> vector<8x8xf32>
    %c0_70 = arith.constant 0 : index
    %c1_71 = arith.constant 1 : index
    %c0_72 = arith.constant 0 : index
    %c0_73 = arith.constant 0 : index
    %79 = vector.load %arg11[%c0_70, %c1_71, %c0_72, %c0_73] : memref<1x4x8x32xf32, #tpu.memory_space<vmem>>, vector<1x1x8x32xf32>
    %80 = vector.shape_cast %79 : vector<1x1x8x32xf32> to vector<8x32xf32>
    %cst_74 = arith.constant dense<0.000000e+00> : vector<8x32xf32>
    %81 = tpu.matmul %78, %80, %cst_74 {dimension_numbers = #tpu.dot_dimension_numbers<[1], [0], [0], [1], [0, 0, 1, 1], [], []>} : vector<8x8xf32>, vector<8x32xf32>, vector<8x32xf32> -> vector<8x32xf32>
    %82 = arith.addf %43, %81 : vector<8x32xf32>
    %c0_75 = arith.constant 0 : index
    %c2 = arith.constant 2 : index
    %c0_76 = arith.constant 0 : index
    %c0_77 = arith.constant 0 : index
    %83 = vector.load %arg5[%c0_75, %c2, %c0_76, %c0_77] : memref<1x4x32x8xf32, #tpu.memory_space<vmem>>, vector<1x1x32x8xf32>
    %84 = vector.shape_cast %83 : vector<1x1x32x8xf32> to vector<32x8xf32>
    %cst_78 = arith.constant dense<0.000000e+00> : vector<8x8xf32>
    %85 = tpu.matmul %3, %84, %cst_78 {dimension_numbers = #tpu.dot_dimension_numbers<[1], [0], [0], [1], [0, 0, 1, 1], [], []>} : vector<8x32xf32>, vector<32x8xf32>, vector<8x8xf32> -> vector<8x8xf32>
    %c0_79 = arith.constant 0 : index
    %c2_80 = arith.constant 2 : index
    %c0_81 = arith.constant 0 : index
    %c0_82 = arith.constant 0 : index
    %86 = vector.load %arg6[%c0_79, %c2_80, %c0_81, %c0_82] : memref<1x4x1x8xf32, #tpu.memory_space<vmem>>, vector<1x1x1x8xf32>
    %87 = vector.shape_cast %86 : vector<1x1x1x8xf32> to vector<1x8xf32>
    %88 = vector.broadcast %87 : vector<1x8xf32> to vector<8x8xf32>
    %89 = arith.addf %85, %88 : vector<8x8xf32>
    %c0_83 = arith.constant 0 : index
    %c2_84 = arith.constant 2 : index
    %c0_85 = arith.constant 0 : index
    %c0_86 = arith.constant 0 : index
    %90 = vector.load %arg7[%c0_83, %c2_84, %c0_85, %c0_86] : memref<1x4x32x8xf32, #tpu.memory_space<vmem>>, vector<1x1x32x8xf32>
    %91 = vector.shape_cast %90 : vector<1x1x32x8xf32> to vector<32x8xf32>
    %cst_87 = arith.constant dense<0.000000e+00> : vector<8x8xf32>
    %92 = tpu.matmul %3, %91, %cst_87 {dimension_numbers = #tpu.dot_dimension_numbers<[1], [0], [0], [1], [0, 0, 1, 1], [], []>} : vector<8x32xf32>, vector<32x8xf32>, vector<8x8xf32> -> vector<8x8xf32>
    %c0_88 = arith.constant 0 : index
    %c2_89 = arith.constant 2 : index
    %c0_90 = arith.constant 0 : index
    %c0_91 = arith.constant 0 : index
    %93 = vector.load %arg8[%c0_88, %c2_89, %c0_90, %c0_91] : memref<1x4x1x8xf32, #tpu.memory_space<vmem>>, vector<1x1x1x8xf32>
    %94 = vector.shape_cast %93 : vector<1x1x1x8xf32> to vector<1x8xf32>
    %95 = vector.broadcast %94 : vector<1x8xf32> to vector<8x8xf32>
    %96 = arith.addf %92, %95 : vector<8x8xf32>
    %c0_92 = arith.constant 0 : index
    %c2_93 = arith.constant 2 : index
    %c0_94 = arith.constant 0 : index
    %c0_95 = arith.constant 0 : index
    %97 = vector.load %arg9[%c0_92, %c2_93, %c0_94, %c0_95] : memref<1x4x32x8xf32, #tpu.memory_space<vmem>>, vector<1x1x32x8xf32>
    %98 = vector.shape_cast %97 : vector<1x1x32x8xf32> to vector<32x8xf32>
    %cst_96 = arith.constant dense<0.000000e+00> : vector<8x8xf32>
    %99 = tpu.matmul %3, %98, %cst_96 {dimension_numbers = #tpu.dot_dimension_numbers<[1], [0], [0], [1], [0, 0, 1, 1], [], []>} : vector<8x32xf32>, vector<32x8xf32>, vector<8x8xf32> -> vector<8x8xf32>
    %c0_97 = arith.constant 0 : index
    %c2_98 = arith.constant 2 : index
    %c0_99 = arith.constant 0 : index
    %c0_100 = arith.constant 0 : index
    %100 = vector.load %arg10[%c0_97, %c2_98, %c0_99, %c0_100] : memref<1x4x1x8xf32, #tpu.memory_space<vmem>>, vector<1x1x1x8xf32>
    %101 = vector.shape_cast %100 : vector<1x1x1x8xf32> to vector<1x8xf32>
    %102 = vector.broadcast %101 : vector<1x8xf32> to vector<8x8xf32>
    %103 = arith.addf %99, %102 : vector<8x8xf32>
    %cst_101 = arith.constant dense<0.000000e+00> : vector<8x8xf32>
    %104 = tpu.matmul %89, %96, %cst_101 {dimension_numbers = #tpu.dot_dimension_numbers<[1], [1], [0], [0], [0, 0, 1, 0], [], []>} : vector<8x8xf32>, vector<8x8xf32>, vector<8x8xf32> -> vector<8x8xf32>
    %cst_102 = arith.constant 0.353553385 : f32
    %105 = vector.broadcast %cst_102 : f32 to vector<8x8xf32>
    %106 = arith.mulf %104, %105 : vector<8x8xf32>
    %cst_103 = arith.constant dense<0xFF800000> : vector<8xf32>
    %107 = vector.multi_reduction <maximumf>, %106, %cst_103 [1] : vector<8x8xf32> to vector<8xf32>
    %108 = vector.shape_cast %107 : vector<8xf32> to vector<8x1xf32>
    %109 = vector.broadcast %108 : vector<8x1xf32> to vector<8x8xf32>
    %110 = arith.subf %106, %109 : vector<8x8xf32>
    %111 = math.exp %110 : vector<8x8xf32>
    %cst_104 = arith.constant dense<0.000000e+00> : vector<8xf32>
    %112 = vector.multi_reduction <add>, %111, %cst_104 [1] : vector<8x8xf32> to vector<8xf32>
    %113 = vector.shape_cast %112 : vector<8xf32> to vector<8x1xf32>
    %114 = tpu.reciprocal %113 : vector<8x1xf32> -> vector<8x1xf32>
    %115 = vector.broadcast %114 : vector<8x1xf32> to vector<8x8xf32>
    %116 = arith.mulf %111, %115 : vector<8x8xf32>
    %cst_105 = arith.constant dense<0.000000e+00> : vector<8x8xf32>
    %117 = tpu.matmul %116, %103, %cst_105 {dimension_numbers = #tpu.dot_dimension_numbers<[1], [0], [0], [1], [0, 0, 1, 1], [], []>} : vector<8x8xf32>, vector<8x8xf32>, vector<8x8xf32> -> vector<8x8xf32>
    %c0_106 = arith.constant 0 : index
    %c2_107 = arith.constant 2 : index
    %c0_108 = arith.constant 0 : index
    %c0_109 = arith.constant 0 : index
    %118 = vector.load %arg11[%c0_106, %c2_107, %c0_108, %c0_109] : memref<1x4x8x32xf32, #tpu.memory_space<vmem>>, vector<1x1x8x32xf32>
    %119 = vector.shape_cast %118 : vector<1x1x8x32xf32> to vector<8x32xf32>
    %cst_110 = arith.constant dense<0.000000e+00> : vector<8x32xf32>
    %120 = tpu.matmul %117, %119, %cst_110 {dimension_numbers = #tpu.dot_dimension_numbers<[1], [0], [0], [1], [0, 0, 1, 1], [], []>} : vector<8x8xf32>, vector<8x32xf32>, vector<8x32xf32> -> vector<8x32xf32>
    %121 = arith.addf %82, %120 : vector<8x32xf32>
    %c0_111 = arith.constant 0 : index
    %c3 = arith.constant 3 : index
    %c0_112 = arith.constant 0 : index
    %c0_113 = arith.constant 0 : index
    %122 = vector.load %arg5[%c0_111, %c3, %c0_112, %c0_113] : memref<1x4x32x8xf32, #tpu.memory_space<vmem>>, vector<1x1x32x8xf32>
    %123 = vector.shape_cast %122 : vector<1x1x32x8xf32> to vector<32x8xf32>
    %cst_114 = arith.constant dense<0.000000e+00> : vector<8x8xf32>
    %124 = tpu.matmul %3, %123, %cst_114 {dimension_numbers = #tpu.dot_dimension_numbers<[1], [0], [0], [1], [0, 0, 1, 1], [], []>} : vector<8x32xf32>, vector<32x8xf32>, vector<8x8xf32> -> vector<8x8xf32>
    %c0_115 = arith.constant 0 : index
    %c3_116 = arith.constant 3 : index
    %c0_117 = arith.constant 0 : index
    %c0_118 = arith.constant 0 : index
    %125 = vector.load %arg6[%c0_115, %c3_116, %c0_117, %c0_118] : memref<1x4x1x8xf32, #tpu.memory_space<vmem>>, vector<1x1x1x8xf32>
    %126 = vector.shape_cast %125 : vector<1x1x1x8xf32> to vector<1x8xf32>
    %127 = vector.broadcast %126 : vector<1x8xf32> to vector<8x8xf32>
    %128 = arith.addf %124, %127 : vector<8x8xf32>
    %c0_119 = arith.constant 0 : index
    %c3_120 = arith.constant 3 : index
    %c0_121 = arith.constant 0 : index
    %c0_122 = arith.constant 0 : index
    %129 = vector.load %arg7[%c0_119, %c3_120, %c0_121, %c0_122] : memref<1x4x32x8xf32, #tpu.memory_space<vmem>>, vector<1x1x32x8xf32>
    %130 = vector.shape_cast %129 : vector<1x1x32x8xf32> to vector<32x8xf32>
    %cst_123 = arith.constant dense<0.000000e+00> : vector<8x8xf32>
    %131 = tpu.matmul %3, %130, %cst_123 {dimension_numbers = #tpu.dot_dimension_numbers<[1], [0], [0], [1], [0, 0, 1, 1], [], []>} : vector<8x32xf32>, vector<32x8xf32>, vector<8x8xf32> -> vector<8x8xf32>
    %c0_124 = arith.constant 0 : index
    %c3_125 = arith.constant 3 : index
    %c0_126 = arith.constant 0 : index
    %c0_127 = arith.constant 0 : index
    %132 = vector.load %arg8[%c0_124, %c3_125, %c0_126, %c0_127] : memref<1x4x1x8xf32, #tpu.memory_space<vmem>>, vector<1x1x1x8xf32>
    %133 = vector.shape_cast %132 : vector<1x1x1x8xf32> to vector<1x8xf32>
    %134 = vector.broadcast %133 : vector<1x8xf32> to vector<8x8xf32>
    %135 = arith.addf %131, %134 : vector<8x8xf32>
    %c0_128 = arith.constant 0 : index
    %c3_129 = arith.constant 3 : index
    %c0_130 = arith.constant 0 : index
    %c0_131 = arith.constant 0 : index
    %136 = vector.load %arg9[%c0_128, %c3_129, %c0_130, %c0_131] : memref<1x4x32x8xf32, #tpu.memory_space<vmem>>, vector<1x1x32x8xf32>
    %137 = vector.shape_cast %136 : vector<1x1x32x8xf32> to vector<32x8xf32>
    %cst_132 = arith.constant dense<0.000000e+00> : vector<8x8xf32>
    %138 = tpu.matmul %3, %137, %cst_132 {dimension_numbers = #tpu.dot_dimension_numbers<[1], [0], [0], [1], [0, 0, 1, 1], [], []>} : vector<8x32xf32>, vector<32x8xf32>, vector<8x8xf32> -> vector<8x8xf32>
    %c0_133 = arith.constant 0 : index
    %c3_134 = arith.constant 3 : index
    %c0_135 = arith.constant 0 : index
    %c0_136 = arith.constant 0 : index
    %139 = vector.load %arg10[%c0_133, %c3_134, %c0_135, %c0_136] : memref<1x4x1x8xf32, #tpu.memory_space<vmem>>, vector<1x1x1x8xf32>
    %140 = vector.shape_cast %139 : vector<1x1x1x8xf32> to vector<1x8xf32>
    %141 = vector.broadcast %140 : vector<1x8xf32> to vector<8x8xf32>
    %142 = arith.addf %138, %141 : vector<8x8xf32>
    %cst_137 = arith.constant dense<0.000000e+00> : vector<8x8xf32>
    %143 = tpu.matmul %128, %135, %cst_137 {dimension_numbers = #tpu.dot_dimension_numbers<[1], [1], [0], [0], [0, 0, 1, 0], [], []>} : vector<8x8xf32>, vector<8x8xf32>, vector<8x8xf32> -> vector<8x8xf32>
    %cst_138 = arith.constant 0.353553385 : f32
    %144 = vector.broadcast %cst_138 : f32 to vector<8x8xf32>
    %145 = arith.mulf %143, %144 : vector<8x8xf32>
    %cst_139 = arith.constant dense<0xFF800000> : vector<8xf32>
    %146 = vector.multi_reduction <maximumf>, %145, %cst_139 [1] : vector<8x8xf32> to vector<8xf32>
    %147 = vector.shape_cast %146 : vector<8xf32> to vector<8x1xf32>
    %148 = vector.broadcast %147 : vector<8x1xf32> to vector<8x8xf32>
    %149 = arith.subf %145, %148 : vector<8x8xf32>
    %150 = math.exp %149 : vector<8x8xf32>
    %cst_140 = arith.constant dense<0.000000e+00> : vector<8xf32>
    %151 = vector.multi_reduction <add>, %150, %cst_140 [1] : vector<8x8xf32> to vector<8xf32>
    %152 = vector.shape_cast %151 : vector<8xf32> to vector<8x1xf32>
    %153 = tpu.reciprocal %152 : vector<8x1xf32> -> vector<8x1xf32>
    %154 = vector.broadcast %153 : vector<8x1xf32> to vector<8x8xf32>
    %155 = arith.mulf %150, %154 : vector<8x8xf32>
    %cst_141 = arith.constant dense<0.000000e+00> : vector<8x8xf32>
    %156 = tpu.matmul %155, %142, %cst_141 {dimension_numbers = #tpu.dot_dimension_numbers<[1], [0], [0], [1], [0, 0, 1, 1], [], []>} : vector<8x8xf32>, vector<8x8xf32>, vector<8x8xf32> -> vector<8x8xf32>
    %c0_142 = arith.constant 0 : index
    %c3_143 = arith.constant 3 : index
    %c0_144 = arith.constant 0 : index
    %c0_145 = arith.constant 0 : index
    %157 = vector.load %arg11[%c0_142, %c3_143, %c0_144, %c0_145] : memref<1x4x8x32xf32, #tpu.memory_space<vmem>>, vector<1x1x8x32xf32>
    %158 = vector.shape_cast %157 : vector<1x1x8x32xf32> to vector<8x32xf32>
    %cst_146 = arith.constant dense<0.000000e+00> : vector<8x32xf32>
    %159 = tpu.matmul %156, %158, %cst_146 {dimension_numbers = #tpu.dot_dimension_numbers<[1], [0], [0], [1], [0, 0, 1, 1], [], []>} : vector<8x8xf32>, vector<8x32xf32>, vector<8x32xf32> -> vector<8x32xf32>
    %160 = arith.addf %121, %159 : vector<8x32xf32>
    %c0_147 = arith.constant 0 : index
    %c0_148 = arith.constant 0 : index
    %c0_149 = arith.constant 0 : index
    %161 = vector.load %arg12[%c0_147, %c0_148, %c0_149] : memref<1x1x32xf32, #tpu.memory_space<vmem>>, vector<1x1x32xf32>
    %162 = vector.shape_cast %161 : vector<1x1x32xf32> to vector<1x32xf32>
    %163 = vector.broadcast %162 : vector<1x32xf32> to vector<8x32xf32>
    %164 = arith.addf %160, %163 : vector<8x32xf32>
    %165 = arith.addf %3, %164 : vector<8x32xf32>
    %c0_150 = arith.constant 0 : index
    %c0_151 = arith.constant 0 : index
    %c0_152 = arith.constant 0 : index
    %166 = vector.load %arg13[%c0_150, %c0_151, %c0_152] : memref<1x1x32xf32, #tpu.memory_space<vmem>>, vector<1x1x32xf32>
    %167 = vector.shape_cast %166 : vector<1x1x32xf32> to vector<1x32xf32>
    %c0_153 = arith.constant 0 : index
    %c0_154 = arith.constant 0 : index
    %c0_155 = arith.constant 0 : index
    %168 = vector.load %arg14[%c0_153, %c0_154, %c0_155] : memref<1x1x32xf32, #tpu.memory_space<vmem>>, vector<1x1x32xf32>
    %169 = vector.shape_cast %168 : vector<1x1x32xf32> to vector<1x32xf32>
    %cst_156 = arith.constant dense<0.000000e+00> : vector<8xf32>
    %170 = vector.multi_reduction <add>, %165, %cst_156 [1] : vector<8x32xf32> to vector<8xf32>
    %171 = vector.shape_cast %170 : vector<8xf32> to vector<8x1xf32>
    %cst_157 = arith.constant 3.200000e+01 : f32
    %172 = vector.broadcast %cst_157 : f32 to vector<8x1xf32>
    %173 = arith.divf %171, %172 : vector<8x1xf32>
    %174 = vector.broadcast %173 : vector<8x1xf32> to vector<8x32xf32>
    %175 = arith.subf %165, %174 : vector<8x32xf32>
    %176 = arith.mulf %175, %175 : vector<8x32xf32>
    %cst_158 = arith.constant dense<0.000000e+00> : vector<8xf32>
    %177 = vector.multi_reduction <add>, %176, %cst_158 [1] : vector<8x32xf32> to vector<8xf32>
    %178 = vector.shape_cast %177 : vector<8xf32> to vector<8x1xf32>
    %cst_159 = arith.constant 3.200000e+01 : f32
    %179 = vector.broadcast %cst_159 : f32 to vector<8x1xf32>
    %180 = arith.divf %178, %179 : vector<8x1xf32>
    %181 = vector.broadcast %173 : vector<8x1xf32> to vector<8x32xf32>
    %182 = arith.subf %165, %181 : vector<8x32xf32>
    %cst_160 = arith.constant 9.99999974E-6 : f32
    %183 = vector.broadcast %cst_160 : f32 to vector<8x1xf32>
    %184 = arith.addf %180, %183 : vector<8x1xf32>
    %185 = math.rsqrt %184 : vector<8x1xf32>
    %186 = vector.broadcast %185 : vector<8x1xf32> to vector<8x32xf32>
    %187 = arith.mulf %182, %186 : vector<8x32xf32>
    %188 = vector.broadcast %167 : vector<1x32xf32> to vector<8x32xf32>
    %189 = arith.mulf %187, %188 : vector<8x32xf32>
    %190 = vector.broadcast %169 : vector<1x32xf32> to vector<8x32xf32>
    %191 = arith.addf %189, %190 : vector<8x32xf32>
    %c0_161 = arith.constant 0 : index
    %c0_162 = arith.constant 0 : index
    %c0_163 = arith.constant 0 : index
    %192 = vector.load %arg15[%c0_161, %c0_162, %c0_163] : memref<1x32x128xf32, #tpu.memory_space<vmem>>, vector<1x32x128xf32>
    %193 = vector.shape_cast %192 : vector<1x32x128xf32> to vector<32x128xf32>
    %cst_164 = arith.constant dense<0.000000e+00> : vector<8x128xf32>
    %194 = tpu.matmul %191, %193, %cst_164 {dimension_numbers = #tpu.dot_dimension_numbers<[1], [0], [0], [1], [0, 0, 1, 1], [], []>} : vector<8x32xf32>, vector<32x128xf32>, vector<8x128xf32> -> vector<8x128xf32>
    %c0_165 = arith.constant 0 : index
    %c0_166 = arith.constant 0 : index
    %c0_167 = arith.constant 0 : index
    %195 = vector.load %arg16[%c0_165, %c0_166, %c0_167] : memref<1x1x128xf32, #tpu.memory_space<vmem>>, vector<1x1x128xf32>
    %196 = vector.shape_cast %195 : vector<1x1x128xf32> to vector<1x128xf32>
    %197 = vector.broadcast %196 : vector<1x128xf32> to vector<8x128xf32>
    %198 = arith.addf %194, %197 : vector<8x128xf32>
    %cst_168 = arith.constant 0.000000e+00 : f32
    %199 = vector.broadcast %cst_168 : f32 to vector<8x128xf32>
    %200 = arith.maximumf %198, %199 : vector<8x128xf32>
    %c0_169 = arith.constant 0 : index
    %c0_170 = arith.constant 0 : index
    %c0_171 = arith.constant 0 : index
    %201 = vector.load %arg17[%c0_169, %c0_170, %c0_171] : memref<1x128x32xf32, #tpu.memory_space<vmem>>, vector<1x128x32xf32>
    %202 = vector.shape_cast %201 : vector<1x128x32xf32> to vector<128x32xf32>
    %cst_172 = arith.constant dense<0.000000e+00> : vector<8x32xf32>
    %203 = tpu.matmul %200, %202, %cst_172 {dimension_numbers = #tpu.dot_dimension_numbers<[1], [0], [0], [1], [0, 0, 1, 1], [], []>} : vector<8x128xf32>, vector<128x32xf32>, vector<8x32xf32> -> vector<8x32xf32>
    %c0_173 = arith.constant 0 : index
    %c0_174 = arith.constant 0 : index
    %c0_175 = arith.constant 0 : index
    %204 = vector.load %arg18[%c0_173, %c0_174, %c0_175] : memref<1x1x32xf32, #tpu.memory_space<vmem>>, vector<1x1x32xf32>
    %205 = vector.shape_cast %204 : vector<1x1x32xf32> to vector<1x32xf32>
    %206 = vector.broadcast %205 : vector<1x32xf32> to vector<8x32xf32>
    %207 = arith.addf %203, %206 : vector<8x32xf32>
    %208 = arith.addf %191, %207 : vector<8x32xf32>
    %c0_176 = arith.constant 0 : index
    %c0_177 = arith.constant 0 : index
    %c0_178 = arith.constant 0 : index
    %209 = vector.load %arg19[%c0_176, %c0_177, %c0_178] : memref<1x1x32xf32, #tpu.memory_space<vmem>>, vector<1x1x32xf32>
    %210 = vector.shape_cast %209 : vector<1x1x32xf32> to vector<1x32xf32>
    %c0_179 = arith.constant 0 : index
    %c0_180 = arith.constant 0 : index
    %c0_181 = arith.constant 0 : index
    %211 = vector.load %arg20[%c0_179, %c0_180, %c0_181] : memref<1x1x32xf32, #tpu.memory_space<vmem>>, vector<1x1x32xf32>
    %212 = vector.shape_cast %211 : vector<1x1x32xf32> to vector<1x32xf32>
    %cst_182 = arith.constant dense<0.000000e+00> : vector<8xf32>
    %213 = vector.multi_reduction <add>, %208, %cst_182 [1] : vector<8x32xf32> to vector<8xf32>
    %214 = vector.shape_cast %213 : vector<8xf32> to vector<8x1xf32>
    %cst_183 = arith.constant 3.200000e+01 : f32
    %215 = vector.broadcast %cst_183 : f32 to vector<8x1xf32>
    %216 = arith.divf %214, %215 : vector<8x1xf32>
    %217 = vector.broadcast %216 : vector<8x1xf32> to vector<8x32xf32>
    %218 = arith.subf %208, %217 : vector<8x32xf32>
    %219 = arith.mulf %218, %218 : vector<8x32xf32>
    %cst_184 = arith.constant dense<0.000000e+00> : vector<8xf32>
    %220 = vector.multi_reduction <add>, %219, %cst_184 [1] : vector<8x32xf32> to vector<8xf32>
    %221 = vector.shape_cast %220 : vector<8xf32> to vector<8x1xf32>
    %cst_185 = arith.constant 3.200000e+01 : f32
    %222 = vector.broadcast %cst_185 : f32 to vector<8x1xf32>
    %223 = arith.divf %221, %222 : vector<8x1xf32>
    %224 = vector.broadcast %216 : vector<8x1xf32> to vector<8x32xf32>
    %225 = arith.subf %208, %224 : vector<8x32xf32>
    %cst_186 = arith.constant 9.99999974E-6 : f32
    %226 = vector.broadcast %cst_186 : f32 to vector<8x1xf32>
    %227 = arith.addf %223, %226 : vector<8x1xf32>
    %228 = math.rsqrt %227 : vector<8x1xf32>
    %229 = vector.broadcast %228 : vector<8x1xf32> to vector<8x32xf32>
    %230 = arith.mulf %225, %229 : vector<8x32xf32>
    %231 = vector.broadcast %210 : vector<1x32xf32> to vector<8x32xf32>
    %232 = arith.mulf %230, %231 : vector<8x32xf32>
    %233 = vector.broadcast %212 : vector<1x32xf32> to vector<8x32xf32>
    %234 = arith.addf %232, %233 : vector<8x32xf32>
    %c0_187 = arith.constant 0 : index
    %c0_188 = arith.constant 0 : index
    %235 = vector.load %arg24[%c0_187, %c0_188] : memref<8x32xf32, #tpu.memory_space<vmem>>, vector<8x32xf32>
    tpu.vector_store %arg24[%c0_187, %c0_188], %234 {strides = array<i32>} : memref<8x32xf32, #tpu.memory_space<vmem>>, vector<8x32xf32>,
    %c1_i32 = arith.constant 1 : i32
    %236 = arith.cmpi eq, %arg1, %c1_i32 : i32
    %237 = arith.extui %236 : i1 to i32
    %c0_i32_189 = arith.constant 0 : i32
    %238 = arith.cmpi ne, %237, %c0_i32_189 : i32
    scf.if %238 {
      %c0_190 = arith.constant 0 : index
      %c0_191 = arith.constant 0 : index
      %239 = vector.load %arg21[%c0_190, %c0_191] : memref<32x16xf32, #tpu.memory_space<vmem>>, vector<32x16xf32>
      %cst_192 = arith.constant dense<0.000000e+00> : vector<8x16xf32>
      %240 = tpu.matmul %234, %239, %cst_192 {dimension_numbers = #tpu.dot_dimension_numbers<[1], [0], [0], [1], [0, 0, 1, 1], [], []>} : vector<8x32xf32>, vector<32x16xf32>, vector<8x16xf32> -> vector<8x16xf32>
      %c0_193 = arith.constant 0 : index
      %c0_194 = arith.constant 0 : index
      %241 = vector.load %arg22[%c0_193, %c0_194] : memref<1x16xf32, #tpu.memory_space<vmem>>, vector<1x16xf32>
      %242 = vector.broadcast %241 : vector<1x16xf32> to vector<8x16xf32>
      %243 = arith.addf %240, %242 : vector<8x16xf32>
      %cst_195 = arith.constant dense<0xFF800000> : vector<16xf32>
      %244 = vector.multi_reduction <maximumf>, %243, %cst_195 [0] : vector<8x16xf32> to vector<16xf32>
      %245 = vector.shape_cast %244 : vector<16xf32> to vector<1x16xf32>
      %c0_196 = arith.constant 0 : index
      %c0_197 = arith.constant 0 : index
      %c0_198 = arith.constant 0 : index
      %246 = vector.load %arg23[%c0_196, %c0_197, %c0_198] : memref<1x1x16xf32, #tpu.memory_space<vmem>>, vector<1x1x16xf32>
      %247 = vector.shape_cast %246 : vector<1x1x16xf32> to vector<1x16xf32>
      %248 = vector.shape_cast %245 : vector<1x16xf32> to vector<1x1x16xf32>
      tpu.vector_store %arg23[%c0_196, %c0_197, %c0_198], %248 {strides = array<i32>} : memref<1x1x16xf32, #tpu.memory_space<vmem>>, vector<1x1x16xf32>,
    } else {
    }
    return
  }
  func.func @transform_0(%arg0: i32, %arg1: i32) -> (i32, i32, i32) {
    %c0_i32 = arith.constant 0 : i32
    %c0_i32_0 = arith.constant 0 : i32
    %c0_i32_1 = arith.constant 0 : i32
    return %arg0, %c0_i32, %c0_i32_0 : i32, i32, i32
  }
  func.func @transform_1(%arg0: i32, %arg1: i32) -> (i32, i32) {
    %c0_i32 = arith.constant 0 : i32
    %c0_i32_0 = arith.constant 0 : i32
    %c0_i32_1 = arith.constant 0 : i32
    return %c0_i32, %c0_i32_0 : i32, i32
  }
  func.func @transform_2(%arg0: i32, %arg1: i32) -> (i32, i32) {
    %c0_i32 = arith.constant 0 : i32
    %c0_i32_0 = arith.constant 0 : i32
    %c0_i32_1 = arith.constant 0 : i32
    return %c0_i32, %c0_i32_0 : i32, i32
  }
  func.func @transform_3(%arg0: i32, %arg1: i32) -> (i32, i32, i32, i32) {
    %c0_i32 = arith.constant 0 : i32
    %c0_i32_0 = arith.constant 0 : i32
    %c0_i32_1 = arith.constant 0 : i32
    %c0_i32_2 = arith.constant 0 : i32
    return %arg1, %c0_i32, %c0_i32_0, %c0_i32_1 : i32, i32, i32, i32
  }
  func.func @transform_4(%arg0: i32, %arg1: i32) -> (i32, i32, i32, i32) {
    %c0_i32 = arith.constant 0 : i32
    %c0_i32_0 = arith.constant 0 : i32
    %c0_i32_1 = arith.constant 0 : i32
    %c0_i32_2 = arith.constant 0 : i32
    return %arg1, %c0_i32, %c0_i32_0, %c0_i32_1 : i32, i32, i32, i32
  }
  func.func @transform_5(%arg0: i32, %arg1: i32) -> (i32, i32, i32, i32) {
    %c0_i32 = arith.constant 0 : i32
    %c0_i32_0 = arith.constant 0 : i32
    %c0_i32_1 = arith.constant 0 : i32
    %c0_i32_2 = arith.constant 0 : i32
    return %arg1, %c0_i32, %c0_i32_0, %c0_i32_1 : i32, i32, i32, i32
  }
  func.func @transform_6(%arg0: i32, %arg1: i32) -> (i32, i32, i32, i32) {
    %c0_i32 = arith.constant 0 : i32
    %c0_i32_0 = arith.constant 0 : i32
    %c0_i32_1 = arith.constant 0 : i32
    %c0_i32_2 = arith.constant 0 : i32
    return %arg1, %c0_i32, %c0_i32_0, %c0_i32_1 : i32, i32, i32, i32
  }
  func.func @transform_7(%arg0: i32, %arg1: i32) -> (i32, i32, i32, i32) {
    %c0_i32 = arith.constant 0 : i32
    %c0_i32_0 = arith.constant 0 : i32
    %c0_i32_1 = arith.constant 0 : i32
    %c0_i32_2 = arith.constant 0 : i32
    return %arg1, %c0_i32, %c0_i32_0, %c0_i32_1 : i32, i32, i32, i32
  }
  func.func @transform_8(%arg0: i32, %arg1: i32) -> (i32, i32, i32, i32) {
    %c0_i32 = arith.constant 0 : i32
    %c0_i32_0 = arith.constant 0 : i32
    %c0_i32_1 = arith.constant 0 : i32
    %c0_i32_2 = arith.constant 0 : i32
    return %arg1, %c0_i32, %c0_i32_0, %c0_i32_1 : i32, i32, i32, i32
  }
  func.func @transform_9(%arg0: i32, %arg1: i32) -> (i32, i32, i32, i32) {
    %c0_i32 = arith.constant 0 : i32
    %c0_i32_0 = arith.constant 0 : i32
    %c0_i32_1 = arith.constant 0 : i32
    %c0_i32_2 = arith.constant 0 : i32
    return %arg1, %c0_i32, %c0_i32_0, %c0_i32_1 : i32, i32, i32, i32
  }
  func.func @transform_10(%arg0: i32, %arg1: i32) -> (i32, i32, i32) {
    %c0_i32 = arith.constant 0 : i32
    %c0_i32_0 = arith.constant 0 : i32
    %c0_i32_1 = arith.constant 0 : i32
    return %arg1, %c0_i32, %c0_i32_0 : i32, i32, i32
  }
  func.func @transform_11(%arg0: i32, %arg1: i32) -> (i32, i32, i32) {
    %c0_i32 = arith.constant 0 : i32
    %c0_i32_0 = arith.constant 0 : i32
    %c0_i32_1 = arith.constant 0 : i32
    return %arg1, %c0_i32, %c0_i32_0 : i32, i32, i32
  }
  func.func @transform_12(%arg0: i32, %arg1: i32) -> (i32, i32, i32) {
    %c0_i32 = arith.constant 0 : i32
    %c0_i32_0 = arith.constant 0 : i32
    %c0_i32_1 = arith.constant 0 : i32
    return %arg1, %c0_i32, %c0_i32_0 : i32, i32, i32
  }
  func.func @transform_13(%arg0: i32, %arg1: i32) -> (i32, i32, i32) {
    %c0_i32 = arith.constant 0 : i32
    %c0_i32_0 = arith.constant 0 : i32
    %c0_i32_1 = arith.constant 0 : i32
    return %arg1, %c0_i32, %c0_i32_0 : i32, i32, i32
  }
  func.func @transform_14(%arg0: i32, %arg1: i32) -> (i32, i32, i32) {
    %c0_i32 = arith.constant 0 : i32
    %c0_i32_0 = arith.constant 0 : i32
    %c0_i32_1 = arith.constant 0 : i32
    return %arg1, %c0_i32, %c0_i32_0 : i32, i32, i32
  }
  func.func @transform_15(%arg0: i32, %arg1: i32) -> (i32, i32, i32) {
    %c0_i32 = arith.constant 0 : i32
    %c0_i32_0 = arith.constant 0 : i32
    %c0_i32_1 = arith.constant 0 : i32
    return %arg1, %c0_i32, %c0_i32_0 : i32, i32, i32
  }
  func.func @transform_16(%arg0: i32, %arg1: i32) -> (i32, i32, i32) {
    %c0_i32 = arith.constant 0 : i32
    %c0_i32_0 = arith.constant 0 : i32
    %c0_i32_1 = arith.constant 0 : i32
    return %arg1, %c0_i32, %c0_i32_0 : i32, i32, i32
  }
  func.func @transform_17(%arg0: i32, %arg1: i32) -> (i32, i32, i32) {
    %c0_i32 = arith.constant 0 : i32
    %c0_i32_0 = arith.constant 0 : i32
    %c0_i32_1 = arith.constant 0 : i32
    return %arg1, %c0_i32, %c0_i32_0 : i32, i32, i32
  }
  func.func @transform_18(%arg0: i32, %arg1: i32) -> (i32, i32, i32) {
    %c0_i32 = arith.constant 0 : i32
    %c0_i32_0 = arith.constant 0 : i32
    %c0_i32_1 = arith.constant 0 : i32
    return %arg1, %c0_i32, %c0_i32_0 : i32, i32, i32
  }
  func.func @transform_19(%arg0: i32, %arg1: i32) -> (i32, i32) {
    %c0_i32 = arith.constant 0 : i32
    %c0_i32_0 = arith.constant 0 : i32
    %c0_i32_1 = arith.constant 0 : i32
    return %c0_i32, %c0_i32_0 : i32, i32
  }
  func.func @transform_20(%arg0: i32, %arg1: i32) -> (i32, i32) {
    %c0_i32 = arith.constant 0 : i32
    %c0_i32_0 = arith.constant 0 : i32
    %c0_i32_1 = arith.constant 0 : i32
    return %c0_i32, %c0_i32_0 : i32, i32
  }
  func.func @transform_21(%arg0: i32, %arg1: i32) -> (i32, i32, i32) {
    %c0_i32 = arith.constant 0 : i32
    %c0_i32_0 = arith.constant 0 : i32
    %c0_i32_1 = arith.constant 0 : i32
    return %arg0, %c0_i32, %c0_i32_0 : i32, i32, i32
  }
}

</mosaic_0001>

<bundles_post_ra>
// kernel: tpu_custom_call.1
= control target key start
LH: loop header
LB: loop body
LE: loop exit
PB: predicated region body
PF: predicated region fallthrough
CT: control target
= control target key end

     0   :  { %s4915_s0 = inlined_call_operand.vmem [shape: f32[2,8,4], index: 0, kind: input, shape index: {}]   ;;  %s4916_s1 = inlined_call_operand.vmem [shape: f32[4,32], index: 1, kind: input, shape index: {}]   ;;  %s4917_s2 = inlined_call_operand.vmem [shape: f32[1,32], index: 2, kind: input, shape index: {}]   ;;  %s4918_s3 = inlined_call_operand.vmem [shape: f32[2,4,32,8], index: 3, kind: input, shape index: {}]   ;;  %s4919_s4 = inlined_call_operand.vmem [shape: f32[2,4,1,8], index: 4, kind: input, shape index: {}]   ;;  %s4920_s5 = inlined_call_operand.vmem [shape: f32[2,4,32,8], index: 5, kind: input, shape index: {}]   ;;  %s4921_s6 = inlined_call_operand.vmem [shape: f32[2,4,1,8], index: 6, kind: input, shape index: {}]   ;;  %s4922_s7 = inlined_call_operand.vmem [shape: f32[2,4,32,8], index: 7, kind: input, shape index: {}]   ;;  %s4923_s8 = inlined_call_operand.vmem [shape: f32[2,4,1,8], index: 8, kind: input, shape index: {}]   ;;  %s4924_s9 = inlined_call_operand.vmem [shape: f32[2,4,8,32], index: 9, kind: input, shape index: {}]   ;;  %s4925_s10 = inlined_call_operand.vmem [shape: f32[2,1,32], index: 10, kind: input, shape index: {}]   ;;  %s4926_s11 = inlined_call_operand.vmem [shape: f32[2,1,32], index: 11, kind: input, shape index: {}]   ;;  %s4927_s12 = inlined_call_operand.vmem [shape: f32[2,1,32], index: 12, kind: input, shape index: {}]   ;;  %s4928_s13 = inlined_call_operand.vmem [shape: f32[2,32,128], index: 13, kind: input, shape index: {}]   ;;  %s4929_s14 = inlined_call_operand.vmem [shape: f32[2,1,128], index: 14, kind: input, shape index: {}]   ;;  %s4930_s15 = inlined_call_operand.vmem [shape: f32[2,128,32], index: 15, kind: input, shape index: {}]   ;;  %s4931_s16 = inlined_call_operand.vmem [shape: f32[2,1,32], index: 16, kind: input, shape index: {}]   ;;  %s4932_s17 = inlined_call_operand.vmem [shape: f32[2,1,32], index: 17, kind: input, shape index: {}]   ;;  %s4933_s18 = inlined_call_operand.vmem [shape: f32[2,1,32], index: 18, kind: input, shape index: {}]   ;;  %s4934_s19 = inlined_call_operand.vmem [shape: f32[32,16], index: 19, kind: input, shape index: {}]   ;;  %s4935_s20 = inlined_call_operand.vmem [shape: f32[1,16], index: 20, kind: input, shape index: {}]   ;;  %s4936_s21 = inlined_call_operand.hbm [shape: f32[2,1,16], index: 21, kind: output, shape index: {}]  }
   0x1   :  { %4956 = sst [smem:[#allocation23_spill]] %s4915_s0 }
   0x2   :  { %4957 = sst [smem:[#allocation24_spill]] %s4916_s1 }
   0x3   :  { %4958 = sst [smem:[#allocation25_spill]] %s4917_s2 }
   0x4   :  { %4959 = sst [smem:[#allocation26_spill]] %s4918_s3 }
   0x5   :  { %4960 = sst [smem:[#allocation27_spill]] %s4919_s4 }
   0x6   :  { %4961 = sst [smem:[#allocation28_spill]] %s4920_s5 }
   0x7   :  { %4962 = sst [smem:[#allocation29_spill]] %s4921_s6 }
   0x8   :  { %4963 = sst [smem:[#allocation30_spill]] %s4922_s7 }
   0x9   :  { %4964 = sst [smem:[#allocation31_spill]] %s4923_s8 }
   0xa   :  { %4965 = sst [smem:[#allocation32_spill]] %s4924_s9 }
   0xb   :  { %4966 = sst [smem:[#allocation33_spill]] %s4928_s13 }
   0xc   :  { %4967 = sst [smem:[#allocation34_spill]] %s4933_s18 }
   0xd   :  { %4968 = sst [smem:[#allocation35_spill]] %s4934_s19 }
   0xe   :  { %4969 = sst [smem:[#allocation36_spill]] %s4935_s20 }
   0xf   :  { %4970 = sst [smem:[#allocation37_spill]] %s4936_s21 }
  0x10   :  { %26 = vsyncpa [#allocation4], 0 }
  0x11   :  { %28 = vsyncpa [#allocation4 + $0x1], 0  ;;  %s4370_s2 = smov 0   ;;  %s4372_s25 = smov 0  }
  0x12   :  { %s4374_s26 = smov 0   ;;  %s4376_s27 = smov 0  }
  0x13   :  { %s4378_s3 = smov 0   ;;  %s4380_s28 = smov 0  }
  0x14   :  { %s4382_s29 = smov 0   ;;  %s4384_s0 = smov 0  }
  0x15 LB: > { %4971 = sst [smem:[#allocation6_spill]] %s4223_s2  ;;  %s3562_s4 = sadd.s32 4294967295, %s4251_s0   ;;  %s4251_s0 = sphi %s4384_s0, %s34_s0   ;;  %s4247_s29 = sphi %s4382_s29, %s5029_s29   ;;  %s4243_s28 = sphi %s4380_s28, %s5028_s28   ;;  %s4239_s3 = sphi %s4378_s3, %s5027_s3   ;;  %s4235_s27 = sphi %s4376_s27, %s5032_s27   ;;  %s4231_s26 = sphi %s4374_s26, %s5025_s26   ;;  %s4227_s25 = sphi %s4372_s25, %s5031_s25   ;;  %s4223_s2 = sphi %s4370_s2, %s5030_s2  }
  0x16   : > { %4972 = sst [smem:[#allocation7_spill]] %s4231_s26  ;;  %s3563_s30 = sadd.s32 4294967294, %s4251_s0  }
  0x17   : > { %4973 = sst [smem:[#allocation8_spill]] %s4235_s27  ;;  %s43_s5 = sadd.s32 1, %s4243_s28 }
  0x18   : > { %4974 = sst [smem:[#allocation9_spill]] %s4239_s3  ;;  %p44_p0 = scmp.ge.s32.totalorder %s43_s5, 2 }
  0x19   : > { %4975 = sst [smem:[#allocation10_spill]] %s4243_s28  ;;  %s46_s22 = sadd.s32 1, %s4247_s29 }
  0x1a   : > { %4976 = sst [smem:[#allocation11_spill]] %s4247_s29  ;;  %p589_p1 = scmp.ne.s32.totalorder %s4231_s26, %s4227_s25 }
  0x1b   : > { %4977 = sst [smem:[#allocation12_spill]] %s4251_s0  ;;  %p590_p2 = scmp.eq.s32.totalorder %s3562_s4, 3 }
  0x1c   : > { %s5034_s5 = smov (%p44_p0, %s43_s5), 0  ;;  %s5036_s22 = smov (!%p44_p0, %s46_s22), %s4247_s29 }
  0x1d   : > { %4978 = sst [smem:[#allocation13_spill]] %s5034_s5  ;;  %p4419_p3 = por %p590_p2, %p589_p1 }
  0x1e   : > { %p595_p4 = scmp.ne.s32.totalorder %s4227_s25, %s4223_s2  ;;  %p48_p5 = scmp.ge.s32.totalorder %s5036_s22, 2 }
  0x1f   : > { %s4979_s23 = scalar_select %p4419_p3, 1, 0 }
  0x20   : > { %p596_p6 = scmp.eq.s32.totalorder %s3563_s30, 3  ;;  %p3566_p7 = scmp.ge.s32.totalorder %s4251_s0, 1 }
  0x21   : > { %4980 = sst [smem:[#allocation14_spill]] %s4979_s23  ;;  %p744_p8 = scmp.lt.s32.totalorder %s4251_s0, 5 }
  0x22   : > { %s5038_s22 = smov (%p48_p5, %s5036_s22), 0  ;;  %p4429_p9 = por %p596_p6, %p595_p4 }
  0x23   : > { %4981 = sst [smem:[#allocation15_spill]] %s5038_s22  ;;  %p745_p10 = pnand %p3566_p7, %p744_p8 }
  0x24   : > { %s4982_s1 = scalar_select %p4429_p9, 1, 0 }
  0x25   : > { %s576_s24 = ssub.s32 %s4247_s29, %s5038_s22  ;;  %s579_s4 = sadd.s32 1, %s4231_s26 }
  0x26   : > { %4983 = sst [smem:[#allocation16_spill]] %s4982_s1  ;;  %p577_p11 = scmp.eq.s32.totalorder %s576_s24, 0 }
  0x27   : > { %748 = sbr.rel (%p745_p10) target bundleno = 5173 (0x1435), region = 104 }
  0x28   : > { %s4437_s5 = scalar_select %p577_p11, %s4231_s26, %s579_s4  }
  0x2a   : > { %4984 = sst [smem:[#allocation17_spill]] %s4437_s5 }
  0x2c   : > { %p865_p12 = scmp.lt.s32.totalorder %s4239_s3, 1  ;;  %p869_p13 = scmp.lt.s32.totalorder %s4235_s27, 1 }
  0x2d   : > { %s4985_s29 = sld [smem:[#allocation23_spill]] }
  0x2e   : > { %s866_s28 = scalar_select %p865_p12, %s4239_s3, 1 }
  0x2f   : > { %s4444_s2 = scalar_select %p869_p13, %s4235_s27, 1 }
  0x30   : > { %s3567_s24 = sshll.u32 %s866_s28, 3  ;;  %s4986_s0 = sld [smem:[#allocation26_spill]] }
  0x31   : > { %s3689_s26 = sshll.u32 %s4444_s2, 7  ;;  %s3570_s23 = sshll.u32 %s4444_s2, 2 }
  0x32   : > { %s4988_s19 = sld [smem:[#allocation27_spill]]  ;;  %s928_s20 = scalar_lea.vmem %s4932_s17, %s4444_s2 }
  0x33   : > { %s868_s5 = scalar_lea.vmem %s4985_s29, %s3567_s24  ;;  %s4990_s22 = sld [smem:[#allocation28_spill]] }
  0x34   : > { %s4992_s6 = sld [smem:[#allocation29_spill]]  ;;  %s4511_s24 = scalar_lea.vmem %s4930_s15, %s3689_s26 }
  0x35   : > { %s4994_s7 = sld [smem:[#allocation30_spill]] }
  0x36   : > { %s4453_s21 = scalar_lea.vmem %s4986_s0, %s3689_s26  ;;  %s4995_s8 = sld [smem:[#allocation31_spill]] }
  0x37   : > { %4987 = sst [smem:[#allocation18_spill]] %s4453_s21  ;;  %s925_s0 = scalar_lea.vmem %s4931_s16, %s4444_s2 }
  0x38   : > { %s4459_s27 = scalar_lea.vmem %s4988_s19, %s3570_s23  ;;  %s4996_s9 = sld [smem:[#allocation32_spill]] }
  0x39   : > { %4989 = sst [smem:[#allocation19_spill]] %s4459_s27  ;;  %s4464_s29 = scalar_lea.vmem %s4990_s22, %s3689_s26 }
  0x3a   : > { %4991 = sst [smem:[#allocation20_spill]] %s4464_s29  ;;  %s4469_s1 = scalar_lea.vmem %s4992_s6, %s3570_s23 }
  0x3b   : > { %4993 = sst [smem:[#allocation21_spill]] %s4469_s1  ;;  %s4474_s21 = scalar_lea.vmem %s4994_s7, %s3689_s26 }
  0x3c   : > { %s4479_s19 = scalar_lea.vmem %s4995_s8, %s3570_s23  ;;  %s3692_s27 = sshll.u32 %s4444_s2, 5 }
  0x3d   : > { %s4998_s13 = sld [smem:[#allocation33_spill]] }
  0x3e   : > { %s4485_s22 = scalar_lea.vmem %s4996_s9, %s3692_s27  ;;  %s917_s9 = scalar_lea.vmem %s4929_s14, %s4444_s2 }
  0x3f   : > { %4997 = sst [smem:[#allocation22_spill]] %s4485_s22 }
  0x40   : > { %s4999_s3 = sld [smem:[#allocation34_spill]] }
  0x41   : > { %s5001_s28 = sld [smem:[#allocation8_spill]] }
  0x43   : > { %s4502_s8 = scalar_lea.vmem %s4998_s13, %s3692_s27  ;;  %s5000_s13 = sand.u32 1, %s4227_s25  }
  0x44   : > { %s4527_s18 = scalar_lea.vmem [#allocation3], %s5000_s13 }
  0x46   : > { %s931_s4 = scalar_lea.vmem %s4999_s3, %s4444_s2 }
  0x47   : > { %p3583_p0 = scmp.ne.s32.totalorder %s5001_s28, 0 }
  0x48   : > { %s5002_s29 = sld [smem:[#allocation24_spill]] (!%p3583_p0) }
  0x49   : > { %935 = sbr.rel (%p3583_p0) target bundleno = 277 (0x115), region = 108  ;;  %s5003_s13 = sld [smem:[#allocation25_spill]] (!%p3583_p0) }
  0x4e   : > { %v937_v0 = vld [vmem:[%s5002_s29] sm:$0xf]  ;;  %vm949_vm0 = vcmask 1043456   ;;  %v4253_v2 = vmov 0.0   ;;  %vm4254_vm1 = vmmov 0   ;;  %vm945_vm2 = vcmask 31744  }
  0x4f   : > { %v936_v1 = vld [vmem:[%s868_s5] sm:$0xff]  ;;  %3808 = vmatprep.subr.mxu0 %v4253_v2  ;;  %3810 = vmatprep.mubr.msk.f32.mxu0 %vm4254_vm1, %v4253_v2  ;;  %vm1023_vm3 = vcmask 261120  }
  0x50   : > { %3809 = vmatpush3.msk.msra.mxu0 %vm949_vm0, %v937_v0  ;;  %v3584_v3 = vld [vmem:[%s5003_s13] ss:$0 sm:$0xff] }
  0x51   : > { %3811 = vmatmul.mubr.msk.f32.vlgmr.msra.gmra.mxu0 %vm945_vm2, %v936_v1 }
 0x111   : > { %v1019_v4 = vpop.f32.mrf.mxu0 }
 0x112   : > { %v1020_v5 = vadd.f32 %v3584_v3, %v1019_v4 }
 0x113   : > { %v3812_v6 = vpop.f32.mrf.mxu0 }
 0x114   : > { %1024 = vst.msk [vmem:[#allocation2] sm:$0xff] %vm1023_vm3, %v1020_v5 }
 0x115 PF: > { %s5004_s7 = sld [smem:[#allocation18_spill]]  ;;  %v4255_v8 = vmov 0.0   ;;  %vm4256_vm4 = vmmov 0   ;;  %vm1037_vm5 = vcmask 261120   ;;  %v1195_v17 = vld [vmem:[%s4474_s21 + $0x18] sm:$0xff]  ;;  %v1194_v18 = vld [vmem:[%s4474_s21 + $0x10] sm:$0xff]  ;;  %s5009_s3 = scalar_lea.vmem %s4925_s10, %s4444_s2 }
 0x116   : > { %3813 = vmatprep.subr.mxu0 %v4255_v8  ;;  %s5005_s5 = sld [smem:[#allocation20_spill]]  ;;  %3821 = vmatprep.mubr.msk.f32.mxu0 %vm4256_vm4, %v4255_v8  ;;  %v1193_v19 = vld [vmem:[%s4474_s21 + $0x8] sm:$0xff]  ;;  %v1192_v20 = vld [vmem:[%s4474_s21] sm:$0xff]  ;;  %vm1273_vm6 = vcmask 64512   ;;  %v3613_v63 = vld [vmem:[%s4474_s21 + $0x38] sm:$0xff]  ;;  %s5010_s26 = scalar_lea.vmem %s4926_s11, %s4444_s2 }
 0x117   : > { %3851 = vmatprep.subr.mxu1 %v4255_v8  ;;  %3853 = vmatprep.mubr.msk.f32.mxu1 %vm4256_vm4, %v4255_v8  ;;  %s5006_s30 = sld [smem:[#allocation21_spill]]  ;;  %v3591_v29 = vld [vmem:[%s4479_s19] ss:$0 sm:$0xff]  ;;  %v3612_v0 = vld [vmem:[%s4474_s21 + $0x30] sm:$0xff]  ;;  %v3611_v1 = vld [vmem:[%s4474_s21 + $0x28] sm:$0xff]  ;;  %s5011_s6 = scalar_lea.vmem %s4927_s12, %s4444_s2 }
 0x118   : > { %s5007_s23 = sld [smem:[#allocation19_spill]]  ;;  %v3610_v2 = vld [vmem:[%s4474_s21 + $0x20] sm:$0xff] }
 0x119   : > { %s5008_s27 = sld [smem:[#allocation22_spill]] }
 0x11b   : > { %v1029_v7 = vld [vmem:[%s5004_s7 + $0x18] sm:$0xff]  ;;  %v1028_v9 = vld [vmem:[%s5004_s7 + $0x10] sm:$0xff]  ;;  %v1027_v10 = vld [vmem:[%s5004_s7 + $0x8] sm:$0xff] }
 0x11c   : > { %3814 = vmatpush3.msra.mxu0 %v1029_v7  ;;  %v1026_v11 = vld [vmem:[%s5004_s7] sm:$0xff]  ;;  %v1114_v13 = vld [vmem:[%s5005_s5 + $0x18] sm:$0xff]  ;;  %v1113_v14 = vld [vmem:[%s5005_s5 + $0x10] sm:$0xff] }
 0x11d   : > { %3815 = vmatprep.subr.mxu0 %v4255_v8  ;;  %v4548_v12 = vld [vmem:[#allocation2] sm:$0xff]  ;;  %v1112_v15 = vld [vmem:[%s5005_s5 + $0x8] sm:$0xff]  ;;  %v3599_v42 = vld [vmem:[%s5004_s7 + $0x38] sm:$0xff] }
 0x11e   : > { %3816 = vmatpush3.msra.mxu0 %v1028_v9  ;;  %v1111_v16 = vld [vmem:[%s5005_s5] sm:$0xff]  ;;  %v3598_v43 = vld [vmem:[%s5004_s7 + $0x30] sm:$0xff]  ;;  %v3597_v44 = vld [vmem:[%s5004_s7 + $0x28] sm:$0xff] }
 0x11f   : > { %3817 = vmatprep.subr.mxu0 %v4255_v8  ;;  %v3589_v23 = vld [vmem:[%s5006_s30] ss:$0 sm:$0xff]  ;;  %v3606_v49 = vld [vmem:[%s5005_s5 + $0x38] sm:$0xff]  ;;  %v3605_v50 = vld [vmem:[%s5005_s5 + $0x30] sm:$0xff] }
 0x120   : > { %3818 = vmatpush3.msra.mxu0 %v1027_v10  ;;  %v3587_v25 = vld [vmem:[%s5007_s23] ss:$0 sm:$0xff]  ;;  %v3604_v51 = vld [vmem:[%s5005_s5 + $0x28] sm:$0xff]  ;;  %v3608_v57 = vld [vmem:[%s5006_s30 + $0x1] ss:$0 sm:$0xff] }
 0x121   : > { %3819 = vmatprep.subr.mxu0 %v4255_v8  ;;  %v3596_v45 = vld [vmem:[%s5004_s7 + $0x20] sm:$0xff] }
 0x122   : > { %3820 = vmatpush3.msra.mxu0 %v1026_v11  ;;  %v3603_v52 = vld [vmem:[%s5005_s5 + $0x20] sm:$0xff] }
 0x123   : > { %3822 = vmatmul.mubr.msk.f32.vlgmr.msra.gmra.mxu0 %vm1037_vm5, %v4548_v12  ;;  %3824 = vmatprep.subr.mxu0 %v4255_v8  ;;  %v3601_v58 = vld [vmem:[%s5007_s23 + $0x1] ss:$0 sm:$0xff] }
 0x124   : > { %3825 = vmatpush3.msra.mxu0 %v1114_v13  ;;  %3832 = vmatprep.mubr.msk.f32.mxu0 %vm4256_vm4, %v4255_v8 }
 0x125   : > { %3826 = vmatprep.subr.mxu0 %v4255_v8 }
 0x126   : > { %3827 = vmatpush3.msra.mxu0 %v1113_v14  ;;  %v3615_v14 = vld [vmem:[%s4479_s19 + $0x1] ss:$0 sm:$0xff] }
 0x127   : > { %3828 = vmatprep.subr.mxu0 %v4255_v8 }
 0x128   : > { %3829 = vmatpush3.msra.mxu0 %v1112_v15 }
 0x129   : > { %3830 = vmatprep.subr.mxu0 %v4255_v8 }
 0x12a   : > { %3831 = vmatpush3.msra.mxu0 %v1111_v16 }
 0x12b   : > { %3833 = vmatmul.mubr.msk.f32.vlgmr.msra.gmra.mxu0 %vm1037_vm5, %v4548_v12  ;;  %3835 = vmatprep.subr.mxu0 %v4255_v8 }
 0x12c   : > { %3843 = vmatprep.mubr.msk.f32.mxu0 %vm4256_vm4, %v4255_v8  ;;  %3836 = vmatpush3.msra.mxu0 %v1195_v17 }
 0x12d   : > { %3837 = vmatprep.subr.mxu0 %v4255_v8 }
 0x12e   : > { %3838 = vmatpush3.msra.mxu0 %v1194_v18  ;;  %v3620_v18 = vld [vmem:[%s5008_s27 + $0x8] sm:$0xff] }
 0x12f   : > { %3839 = vmatprep.subr.mxu0 %v4255_v8 }
 0x130   : > { %3840 = vmatpush3.msra.mxu0 %v1193_v19 }
 0x131   : > { %3841 = vmatprep.subr.mxu0 %v4255_v8 }
 0x132   : > { %3842 = vmatpush3.msra.mxu0 %v1192_v20 }
 0x133   : > { %3844 = vmatmul.mubr.msk.f32.vlgmr.msra.gmra.mxu0 %vm1037_vm5, %v4548_v12  ;;  %3846 = vmatprep.subr.mxu0 %v4255_v8 }
 0x134   : > { %3848 = vmatprep.mubr.msk.f32.mxu0 %vm4256_vm4, %v4255_v8 }
 0x1e3   : > { %v1107_v21 = vpop.f32.mrf.mxu0 }
 0x1e4   : > { %v1108_v28 = vadd.f32 %v3587_v25, %v1107_v21  ;;  %v3631_v25 = vld [vmem:[%s5005_s5 + $0x48] sm:$0xff] }
 0x1e5   : > { %v3823_v22 = vpop.f32.mrf.mxu0 }
 0x1e6   : > { %v1435_v22 = vld [vmem:[%s5008_s27] sm:$0xff] }
 0x1eb   : > { %v1188_v24 = vpop.f32.mrf.mxu0 }
 0x1ec   : > { %v1189_v26 = vadd.f32 %v3589_v23, %v1188_v24  ;;  %v3633_v23 = vld [vmem:[%s5005_s5 + $0x58] sm:$0xff]  ;;  %v3632_v24 = vld [vmem:[%s5005_s5 + $0x50] sm:$0xff] }
 0x1ed   : > { %v3834_v27 = vpop.f32.mrf.mxu0 }
 0x1ee   : > { %3847 = vmatpush3.xpose.msk.msra.mxu0 %vm1273_vm6, %v1189_v26  ;;  %v3630_v26 = vld [vmem:[%s5005_s5 + $0x40] sm:$0xff]  ;;  %v3626_v27 = vld [vmem:[%s5004_s7 + $0x58] sm:$0xff] }
 0x1ef   : > { %3856 = vmatprep.subr.mxu0 %v4255_v8 }
 0x1f1   : > { %3849 = vmatmul.mubr.msk.f32.vlgmr.msra.gmra.mxu0 %vm1273_vm6, %v1108_v28 }
 0x1f2   : > { %3864 = vmatprep.mubr.msk.f32.mxu0 %vm4256_vm4, %v4255_v8  ;;  %3857 = vmatpush3.msra.mxu0 %v3599_v42 }
 0x1f3   : > { %v1269_v30 = vpop.f32.mrf.mxu0  ;;  %3858 = vmatprep.subr.mxu0 %v4255_v8 }
 0x1f4   : > { %v1270_v31 = vadd.f32 %v3591_v29, %v1269_v30  ;;  %3859 = vmatpush3.msra.mxu0 %v3598_v43  ;;  %v3625_v29 = vld [vmem:[%s5004_s7 + $0x50] sm:$0xff] }
 0x1f5   : > { %v3845_v32 = vpop.f32.mrf.mxu0  ;;  %3860 = vmatprep.subr.mxu0 %v4255_v8 }
 0x1f6   : > { %3852 = vmatpush3.msra.mxu1 %v1270_v31  ;;  %3861 = vmatpush3.msra.mxu0 %v3597_v44  ;;  %v3624_v31 = vld [vmem:[%s5004_s7 + $0x48] sm:$0xff] }
 0x1f7   : > { %3867 = vmatprep.subr.mxu1 %v4255_v8  ;;  %3862 = vmatprep.subr.mxu0 %v4255_v8 }
 0x1f8   : > { %3863 = vmatpush3.msra.mxu0 %v3596_v45  ;;  %v3640_v45 = vld [vmem:[%s4474_s21 + $0x58] sm:$0xff] }
 0x1f9   : > { %3865 = vmatmul.mubr.msk.f32.vlgmr.msra.gmra.mxu0 %vm1037_vm5, %v4548_v12  ;;  %3878 = vmatprep.subr.mxu0 %v4255_v8 }
 0x1fa   : > { %3886 = vmatprep.mubr.msk.f32.mxu0 %vm4256_vm4, %v4255_v8  ;;  %3879 = vmatpush3.msra.mxu0 %v3613_v63 }
 0x1fb   : > { %3880 = vmatprep.subr.mxu0 %v4255_v8 }
 0x1fc   : > { %3881 = vmatpush3.msra.mxu0 %v3612_v0 }
 0x1fd   : > { %3882 = vmatprep.subr.mxu0 %v4255_v8 }
 0x1fe   : > { %3883 = vmatpush3.msra.mxu0 %v3611_v1 }
 0x1ff   : > { %3884 = vmatprep.subr.mxu0 %v4255_v8 }
 0x200   : > { %3885 = vmatpush3.msra.mxu0 %v3610_v2  ;;  %v3652_v2 = vld [vmem:[%s5004_s7 + $0x78] sm:$0xff] }
 0x201   : > { %3887 = vmatmul.mubr.msk.f32.vlgmr.msra.gmra.mxu0 %vm1037_vm5, %v4548_v12  ;;  %3899 = vmatprep.subr.mxu0 %v4255_v8 }
 0x202   : > { %3901 = vmatprep.mubr.msk.f32.mxu0 %vm4256_vm4, %v4255_v8  ;;  %3900 = vmatpush3.msra.mxu0 %v3620_v18 }
 0x203   : > { %3909 = vmatprep.subr.mxu0 %v4255_v8 }
 0x2b1   : > { %v1346_v33 = vpop.f32.mrf.mxu0 }
 0x2b2   : > { %v1350_v34 = vmul.f32 0.35355338, %v1346_v33  ;;  %v3623_v33 = vld [vmem:[%s5004_s7 + $0x40] sm:$0xff] }
 0x2b3   : > { %v3850_v35 = vpop.f32.mrf.mxu0 }
 0x2b4   : > { %v1351_v36 = vsel %vm1273_vm6, %v1350_v34, -inf  ;;  %v3635_v35 = vld [vmem:[%s5006_s30 + $0x2] ss:$0 sm:$0xff] }
 0x2b5   : > { %1352 = vmax.xlane.f32.xlu0 %v1351_v36 }
 0x2b9   : > { %v1515_v53 = vpop.f32.mrf.mxu0 }
 0x2ba   : > { %v1516_v61 = vadd.f32 %v3601_v58, %v1515_v53  ;;  %v3642_v58 = vld [vmem:[%s4479_s19 + $0x2] ss:$0 sm:$0xff] }
 0x2bb   : > { %v3866_v54 = vpop.f32.mrf.mxu0 }
 0x2c1   : > { %v1681_v15 = vpop.f32.mrf.mxu0 }
 0x2c2   : > { %v1682_v16 = vadd.f32 %v3615_v14, %v1681_v15 }
 0x2c3   : > { %v3888_v17 = vpop.f32.mrf.mxu0 }
 0x33e   : > { %v1353_v37 = vpop.xlane.xlu0 %1352 }
 0x33f   : > { %v1354_v38 = vsub.f32 %v1350_v34, %v1353_v37 }
 0x341   : > { %v1355_v39 = vmul.f32 1.442695, %v1354_v38 }
 0x343   : > { %4139 = vpow2.f32 %v1355_v39 }
 0x350   : > { %v4140_v40 = vpop.eup %4139 }
 0x351   : > { %v1357_v41 = vsel %vm1273_vm6, %v4140_v40, 0.0 }
 0x352   : > { %1358 = vadd.xlane.f32.xlu0 %v1357_v41  ;;  %v3628_v41 = vld [vmem:[%s5007_s23 + $0x2] ss:$0 sm:$0xff] }
 0x3db   : > { %v1359_v46 = vpop.xlane.xlu0 %1358 }
 0x3dc   : > { %4141 = vrcp.f32 %v1359_v46  ;;  %v3639_v46 = vld [vmem:[%s4474_s21 + $0x50] sm:$0xff] }
 0x3e9   : > { %v4142_v47 = vpop.eup %4141 }
 0x3ea   : > { %v1361_v48 = vmul.f32 %v4142_v47, %v4140_v40  ;;  %v3638_v47 = vld [vmem:[%s4474_s21 + $0x48] sm:$0xff] }
 0x3ec   : > { %3854 = vmatmul.mubr.msk.f32.vlgmr.msra.gmra.mxu1 %vm1273_vm6, %v1361_v48  ;;  %v3637_v48 = vld [vmem:[%s4474_s21 + $0x40] sm:$0xff] }
 0x3ed   : > { %3868 = vmatpush3.msra.mxu1 %v3606_v49  ;;  %3875 = vmatprep.mubr.msk.f32.mxu1 %vm4256_vm4, %v4255_v8 }
 0x3ee   : > { %3869 = vmatprep.subr.mxu1 %v4255_v8 }
 0x3ef   : > { %3870 = vmatpush3.msra.mxu1 %v3605_v50 }
 0x3f0   : > { %3871 = vmatprep.subr.mxu1 %v4255_v8 }
 0x3f1   : > { %3872 = vmatpush3.msra.mxu1 %v3604_v51 }
 0x3f2   : > { %3873 = vmatprep.subr.mxu1 %v4255_v8 }
 0x3f3   : > { %3874 = vmatpush3.msra.mxu1 %v3603_v52 }
 0x3f4   : > { %3876 = vmatmul.mubr.msk.f32.vlgmr.msra.gmra.mxu1 %vm1037_vm5, %v4548_v12  ;;  %3889 = vmatprep.subr.mxu1 %v4255_v8 }
 0x3f5   : > { %3891 = vmatprep.mubr.msk.f32.mxu1 %vm4256_vm4, %v4255_v8 }
 0x4ac   : > { %v1431_v55 = vpop.f32.mrf.mxu1 }
 0x4ae   : > { %v3855_v56 = vpop.f32.mrf.mxu1 }
 0x4b4   : > { %v1598_v59 = vpop.f32.mrf.mxu1 }
 0x4b5   : > { %v1599_v60 = vadd.f32 %v3608_v57, %v1598_v59 }
 0x4b6   : > { %v3877_v62 = vpop.f32.mrf.mxu1 }
 0x4b7   : > { %3890 = vmatpush3.xpose.msk.msra.mxu1 %vm1273_vm6, %v1599_v60  ;;  %v3647_v62 = vld [vmem:[%s5008_s27 + $0x10] sm:$0xff] }
 0x4b8   : > { %3894 = vmatprep.subr.mxu1 %v4255_v8 }
 0x4ba   : > { %3892 = vmatmul.mubr.msk.f32.vlgmr.msra.gmra.mxu1 %vm1273_vm6, %v1516_v61 }
 0x4bb   : > { %3896 = vmatprep.mubr.msk.f32.mxu1 %vm4256_vm4, %v4255_v8  ;;  %3895 = vmatpush3.msra.mxu1 %v1682_v16 }
 0x4bc   : > { %3904 = vmatprep.subr.mxu1 %v4255_v8 }
 0x57a   : > { %v1757_v3 = vpop.f32.mrf.mxu1 }
 0x57b   : > { %v1761_v4 = vmul.f32 0.35355338, %v1757_v3  ;;  %v3651_v3 = vld [vmem:[%s5004_s7 + $0x70] sm:$0xff] }
 0x57c   : > { %v3893_v5 = vpop.f32.mrf.mxu1 }
 0x57d   : > { %v1762_v6 = vsel %vm1273_vm6, %v1761_v4, -inf  ;;  %v3649_v5 = vld [vmem:[%s5004_s7 + $0x60] sm:$0xff] }
 0x57e   : > { %1763 = vmax.xlane.f32.xlu1 %v1762_v6  ;;  %v3659_v6 = vld [vmem:[%s5005_s5 + $0x78] sm:$0xff] }
 0x607   : > { %v1764_v7 = vpop.xlane.xlu1 %1763 }
 0x608   : > { %v1765_v9 = vsub.f32 %v1761_v4, %v1764_v7  ;;  %v3650_v4 = vld [vmem:[%s5004_s7 + $0x68] sm:$0xff] }
 0x60a   : > { %v1766_v10 = vmul.f32 1.442695, %v1765_v9  ;;  %v3658_v9 = vld [vmem:[%s5005_s5 + $0x70] sm:$0xff] }
 0x60c   : > { %4143 = vpow2.f32 %v1766_v10 }
 0x619   : > { %v4144_v11 = vpop.eup %4143 }
 0x61a   : > { %v1768_v13 = vsel %vm1273_vm6, %v4144_v11, 0.0 }
 0x61b   : > { %1769 = vadd.xlane.f32.xlu1 %v1768_v13  ;;  %v3656_v13 = vld [vmem:[%s5005_s5 + $0x60] sm:$0xff] }
 0x6a4   : > { %v1770_v19 = vpop.xlane.xlu1 %1769 }
 0x6a5   : > { %4145 = vrcp.f32 %v1770_v19 }
 0x6b2   : > { %v4146_v20 = vpop.eup %4145 }
 0x6b3   : > { %v1772_v21 = vmul.f32 %v4146_v20, %v4144_v11  ;;  %v3657_v11 = vld [vmem:[%s5005_s5 + $0x68] sm:$0xff]  ;;  %v3661_v20 = vld [vmem:[%s5006_s30 + $0x3] ss:$0 sm:$0xff] }
 0x6b5   : > { %3897 = vmatmul.mubr.msk.f32.vlgmr.msra.gmra.mxu1 %vm1273_vm6, %v1772_v21  ;;  %v3654_v21 = vld [vmem:[%s5007_s23 + $0x3] ss:$0 sm:$0xff] }
 0x6b6   : > { %3905 = vmatpush3.msra.mxu1 %v1435_v22  ;;  %3906 = vmatprep.mubr.msk.f32.mxu1 %vm4256_vm4, %v4255_v8 }
 0x6b7   : > { %3920 = vmatprep.subr.mxu1 %v4255_v8 }
 0x6b9   : > { %3907 = vmatmul.mubr.msk.f32.vlgmr.msra.gmra.mxu1 %vm1273_vm6, %v1431_v55 }
 0x6ba   : > { %3921 = vmatpush3.msra.mxu1 %v3633_v23  ;;  %3928 = vmatprep.mubr.msk.f32.mxu1 %vm4256_vm4, %v4255_v8 }
 0x6bb   : > { %3922 = vmatprep.subr.mxu1 %v4255_v8 }
 0x6bc   : > { %3923 = vmatpush3.msra.mxu1 %v3632_v24 }
 0x6bd   : > { %3924 = vmatprep.subr.mxu1 %v4255_v8 }
 0x6be   : > { %3925 = vmatpush3.msra.mxu1 %v3631_v25 }
 0x6bf   : > { %3926 = vmatprep.subr.mxu1 %v4255_v8 }
 0x6c0   : > { %3927 = vmatpush3.msra.mxu1 %v3630_v26  ;;  %v3666_v26 = vld [vmem:[%s4474_s21 + $0x78] sm:$0xff] }
 0x6c1   : > { %3929 = vmatmul.mubr.msk.f32.vlgmr.msra.gmra.mxu1 %vm1037_vm5, %v4548_v12  ;;  %3942 = vmatprep.subr.mxu1 %v4255_v8 }
 0x6c2   : > { %3944 = vmatprep.mubr.msk.f32.mxu1 %vm4256_vm4, %v4255_v8 }
 0x775   : > { %v1842_v28 = vpop.f32.mrf.mxu1 }
 0x776   : > { %3902 = vmatmul.mubr.msk.f32.vlgmr.msra.gmra.mxu0 %vm1273_vm6, %v1842_v28  ;;  %v3664_v28 = vld [vmem:[%s4474_s21 + $0x68] sm:$0xff] }
 0x777   : > { %3910 = vmatpush3.msra.mxu0 %v3626_v27  ;;  %v3898_v30 = vpop.f32.mrf.mxu1  ;;  %3917 = vmatprep.mubr.msk.f32.mxu0 %vm4256_vm4, %v4255_v8  ;;  %v3665_v27 = vld [vmem:[%s4474_s21 + $0x70] sm:$0xff] }
 0x778   : > { %3911 = vmatprep.subr.mxu0 %v4255_v8 }
 0x779   : > { %3912 = vmatpush3.msra.mxu0 %v3625_v29  ;;  %v4670_v32 = vpop.f32.mrf.mxu1  ;;  %v3663_v29 = vld [vmem:[%s4474_s21 + $0x60] sm:$0xff] }
 0x77a   : > { %3913 = vmatprep.subr.mxu0 %v4255_v8 }
 0x77b   : > { %3914 = vmatpush3.msra.mxu0 %v3624_v31  ;;  %v3908_v34 = vpop.f32.mrf.mxu1 }
 0x77c   : > { %3915 = vmatprep.subr.mxu0 %v4255_v8 }
 0x77d   : > { %3916 = vmatpush3.msra.mxu0 %v3623_v33 }
 0x77e   : > { %3918 = vmatmul.mubr.msk.f32.vlgmr.msra.gmra.mxu0 %vm1037_vm5, %v4548_v12  ;;  %3931 = vmatprep.subr.mxu0 %v4255_v8 }
 0x77f   : > { %3939 = vmatprep.mubr.msk.f32.mxu0 %vm4256_vm4, %v4255_v8  ;;  %3932 = vmatpush3.msra.mxu0 %v3640_v45 }
 0x780   : > { %3933 = vmatprep.subr.mxu0 %v4255_v8 }
 0x781   : > { %v2156_v36 = vpop.f32.mrf.mxu1  ;;  %3934 = vmatpush3.msra.mxu0 %v3639_v46 }
 0x782   : > { %v2157_v37 = vadd.f32 %v3635_v35, %v2156_v36  ;;  %3935 = vmatprep.subr.mxu0 %v4255_v8 }
 0x783   : > { %v3930_v38 = vpop.f32.mrf.mxu1  ;;  %3936 = vmatpush3.msra.mxu0 %v3638_v47 }
 0x784   : > { %3943 = vmatpush3.xpose.msk.msra.mxu1 %vm1273_vm6, %v2157_v37  ;;  %3937 = vmatprep.subr.mxu0 %v4255_v8 }
 0x785   : > { %3947 = vmatprep.subr.mxu1 %v4255_v8  ;;  %3938 = vmatpush3.msra.mxu0 %v3637_v48 }
 0x786   : > { %3940 = vmatmul.mubr.msk.f32.vlgmr.msra.gmra.mxu0 %vm1037_vm5, %v4548_v12  ;;  %3952 = vmatprep.subr.mxu0 %v4255_v8 }
 0x787   : > { %3954 = vmatprep.mubr.msk.f32.mxu0 %vm4256_vm4, %v4255_v8  ;;  %3953 = vmatpush3.msra.mxu0 %v3647_v62  ;;  %v3006_v62 = vld [vmem:[%s4502_s8 + $0x8] sm:$0xff] }
 0x788   : > { %3968 = vmatprep.subr.mxu0 %v4255_v8 }
 0x836   : > { %v4683_v39 = vpop.f32.mrf.mxu0 }
 0x837   : > { %v1991_v16 = vadd.f32 %v4670_v32, %v4683_v39  ;;  %v3668_v39 = vld [vmem:[%s4479_s19 + $0x3] ss:$0 sm:$0xff] }
 0x838   : > { %v3903_v40 = vpop.f32.mrf.mxu0 }
 0x83e   : > { %v2073_v42 = vpop.f32.mrf.mxu0 }
 0x83f   : > { %v2074_v43 = vadd.f32 %v3628_v41, %v2073_v42 }
 0x840   : > { %v3919_v44 = vpop.f32.mrf.mxu0 }
 0x841   : > { %3945 = vmatmul.mubr.msk.f32.vlgmr.msra.gmra.mxu1 %vm1273_vm6, %v2074_v43  ;;  %v3673_v43 = vld [vmem:[%s5008_s27 + $0x18] sm:$0xff]  ;;  %s5013_s27 = sld [smem:[#allocation8_spill]] }
 0x842   : > { %3949 = vmatprep.mubr.msk.f32.mxu1 %vm4256_vm4, %v4255_v8 }
 0x846   : > { %v2239_v59 = vpop.f32.mrf.mxu0 }
 0x847   : > { %v2240_v60 = vadd.f32 %v3642_v58, %v2239_v59  ;;  %p3683_p1 = scmp.ne.s32.totalorder %s5013_s27, 1 }
 0x848   : > { %v3941_v61 = vpop.f32.mrf.mxu0  ;;  %s5016_s1 = sld [smem:[#allocation36_spill]] (!%p3683_p1) }
 0x849   : > { %3948 = vmatpush3.msra.mxu1 %v2240_v60  ;;  %v3008_v61 = vld [vmem:[%s4502_s8 + $0x18] sm:$0xff] }
 0x84a   : > { %3957 = vmatprep.subr.mxu1 %v4255_v8 }
 0x901   : > { %v2315_v49 = vpop.f32.mrf.mxu1 }
 0x902   : > { %v2319_v50 = vmul.f32 0.35355338, %v2315_v49 }
 0x903   : > { %v3946_v51 = vpop.f32.mrf.mxu1 }
 0x904   : > { %v2320_v52 = vsel %vm1273_vm6, %v2319_v50, -inf }
 0x905   : > { %2321 = vmax.xlane.f32.xlu0 %v2320_v52 }
 0x98e   : > { %v2322_v53 = vpop.xlane.xlu0 %2321 }
 0x98f   : > { %v2323_v54 = vsub.f32 %v2319_v50, %v2322_v53  ;;  %v3675_v50 = vld [vmem:[%s5009_s3] ss:$0 sm:$0xff]  ;;  %s5014_s3 = sld [smem:[#allocation35_spill]] (!%p3683_p1) }
 0x991   : > { %v2324_v55 = vmul.f32 1.442695, %v2323_v54 }
 0x993   : > { %4147 = vpow2.f32 %v2324_v55 }
 0x9a0   : > { %v4148_v56 = vpop.eup %4147 }
 0x9a1   : > { %v2326_v57 = vsel %vm1273_vm6, %v4148_v56, 0.0 }
 0x9a2   : > { %2327 = vadd.xlane.f32.xlu1 %v2326_v57 }
 0xa2b   : > { %v2328_v63 = vpop.xlane.xlu1 %2327 }
 0xa2c   : > { %4149 = vrcp.f32 %v2328_v63  ;;  %v3005_v63 = vld [vmem:[%s4502_s8] sm:$0xff] }
 0xa39   : > { %v4150_v0 = vpop.eup %4149 }
 0xa3a   : > { %v2330_v1 = vmul.f32 %v4150_v0, %v4148_v56  ;;  %v3105_v0 = vld [vmem:[%s4511_s24 + $0x78] sm:$0xff] }
 0xa3c   : > { %3950 = vmatmul.mubr.msk.f32.vlgmr.msra.gmra.mxu1 %vm1273_vm6, %v2330_v1  ;;  %v3104_v1 = vld [vmem:[%s4511_s24 + $0x70] sm:$0xff] }
 0xa3d   : > { %3965 = vmatprep.mubr.msk.f32.mxu1 %vm4256_vm4, %v4255_v8  ;;  %3958 = vmatpush3.msra.mxu1 %v3652_v2  ;;  %v3103_v2 = vld [vmem:[%s4511_s24 + $0x68] sm:$0xff] }
 0xa3e   : > { %3959 = vmatprep.subr.mxu1 %v4255_v8 }
 0xa3f   : > { %3960 = vmatpush3.msra.mxu1 %v3651_v3  ;;  %v3102_v3 = vld [vmem:[%s4511_s24 + $0x60] sm:$0xff] }
 0xa40   : > { %3961 = vmatprep.subr.mxu1 %v4255_v8 }
 0xa41   : > { %3962 = vmatpush3.msra.mxu1 %v3650_v4  ;;  %v3101_v4 = vld [vmem:[%s4511_s24 + $0x58] sm:$0xff] }
 0xa42   : > { %3963 = vmatprep.subr.mxu1 %v4255_v8 }
 0xa43   : > { %3964 = vmatpush3.msra.mxu1 %v3649_v5  ;;  %v3100_v5 = vld [vmem:[%s4511_s24 + $0x50] sm:$0xff] }
 0xa44   : > { %3966 = vmatmul.mubr.msk.f32.vlgmr.msra.gmra.mxu1 %vm1037_vm5, %v4548_v12  ;;  %3979 = vmatprep.subr.mxu1 %v4255_v8 }
 0xa45   : > { %3987 = vmatprep.mubr.msk.f32.mxu1 %vm4256_vm4, %v4255_v8  ;;  %3980 = vmatpush3.msra.mxu1 %v3666_v26  ;;  %v3090_v26 = vld [vmem:[%s4511_s24] sm:$0xff] }
 0xa46   : > { %3981 = vmatprep.subr.mxu1 %v4255_v8 }
 0xa47   : > { %3982 = vmatpush3.msra.mxu1 %v3665_v27  ;;  %v3678_v27 = vld [vmem:[%s917_s9] ss:$0 sm:$0xff] }
 0xa48   : > { %3983 = vmatprep.subr.mxu1 %v4255_v8 }
 0xa49   : > { %3984 = vmatpush3.msra.mxu1 %v3664_v28 }
 0xa4a   : > { %3985 = vmatprep.subr.mxu1 %v4255_v8 }
 0xa4b   : > { %3986 = vmatpush3.msra.mxu1 %v3663_v29 }
 0xa4c   : > { %3988 = vmatmul.mubr.msk.f32.vlgmr.msra.gmra.mxu1 %vm1037_vm5, %v4548_v12  ;;  %4000 = vmatprep.subr.mxu1 %v4255_v8 }
 0xa4d   : > { %4002 = vmatprep.mubr.msk.f32.mxu1 %vm4256_vm4, %v4255_v8  ;;  %4001 = vmatpush3.msra.mxu1 %v3673_v43 }
 0xa4e   : > { %4016 = vmatprep.subr.mxu1 %v4255_v8 }
 0xafc   : > { %v2400_v7 = vpop.f32.mrf.mxu1 }
 0xafd   : > { %3955 = vmatmul.mubr.msk.f32.vlgmr.msra.gmra.mxu0 %vm1273_vm6, %v2400_v7  ;;  %v3098_v7 = vld [vmem:[%s4511_s24 + $0x40] sm:$0xff] }
 0xafe   : > { %3969 = vmatpush3.msra.mxu0 %v3659_v6  ;;  %v3951_v10 = vpop.f32.mrf.mxu1  ;;  %3976 = vmatprep.mubr.msk.f32.mxu0 %vm4256_vm4, %v4255_v8  ;;  %v3099_v6 = vld [vmem:[%s4511_s24 + $0x48] sm:$0xff] }
 0xaff   : > { %3970 = vmatprep.subr.mxu0 %v4255_v8  ;;  %v3096_v10 = vld [vmem:[%s4511_s24 + $0x30] sm:$0xff] }
 0xb00   : > { %3971 = vmatpush3.msra.mxu0 %v3658_v9  ;;  %v3097_v9 = vld [vmem:[%s4511_s24 + $0x38] sm:$0xff] }
 0xb01   : > { %3972 = vmatprep.subr.mxu0 %v4255_v8 }
 0xb02   : > { %3973 = vmatpush3.msra.mxu0 %v3657_v11  ;;  %v3095_v11 = vld [vmem:[%s4511_s24 + $0x28] sm:$0xff] }
 0xb03   : > { %3974 = vmatprep.subr.mxu0 %v4255_v8 }
 0xb04   : > { %3975 = vmatpush3.msra.mxu0 %v3656_v13  ;;  %v2559_v14 = vpop.f32.mrf.mxu1  ;;  %v3094_v13 = vld [vmem:[%s4511_s24 + $0x20] sm:$0xff] }
 0xb05   : > { %3977 = vmatmul.mubr.msk.f32.vlgmr.msra.gmra.mxu0 %vm1037_vm5, %v4548_v12  ;;  %3990 = vmatprep.subr.mxu0 %v4255_v8  ;;  %v2560_v24 = vadd.f32 %v3654_v21, %v2559_v14  ;;  %v3093_v14 = vld [vmem:[%s4511_s24 + $0x18] sm:$0xff]  ;;  %v3677_v21 = vld [vmem:[%s5011_s6] ss:$0 sm:$0xff] }
 0xb06   : > { %3992 = vmatprep.mubr.msk.f32.mxu0 %vm4256_vm4, %v4255_v8  ;;  %v3967_v15 = vpop.f32.mrf.mxu1 }
 0xb0c   : > { %v2725_v40 = vpop.f32.mrf.mxu1 }
 0xb0d   : > { %v2726_v41 = vadd.f32 %v3668_v39, %v2725_v40 }
 0xb0e   : > { %v3989_v42 = vpop.f32.mrf.mxu1 }
 0xbbd   : > { %v2475_v17 = vpop.f32.mrf.mxu0 }
 0xbbe   : > { %v2479_v18 = vadd.f32 %v2475_v17, %v1991_v16 }
 0xbbf   : > { %v3956_v19 = vpop.f32.mrf.mxu0 }
 0xbc0   : > { %v3676_v19 = vld [vmem:[%s5010_s26] ss:$0 sm:$0xff] }
 0xbc5   : > { %v2642_v22 = vpop.f32.mrf.mxu0 }
 0xbc6   : > { %v2643_v23 = vadd.f32 %v3661_v20, %v2642_v22 }
 0xbc7   : > { %v3978_v25 = vpop.f32.mrf.mxu0 }
 0xbc8   : > { %3991 = vmatpush3.xpose.msk.msra.mxu0 %vm1273_vm6, %v2643_v23  ;;  %v3091_v25 = vld [vmem:[%s4511_s24 + $0x8] sm:$0xff] }
 0xbc9   : > { %3995 = vmatprep.subr.mxu0 %v4255_v8 }
 0xbcb   : > { %3993 = vmatmul.mubr.msk.f32.vlgmr.msra.gmra.mxu0 %vm1273_vm6, %v2560_v24  ;;  %v3092_v24 = vld [vmem:[%s4511_s24 + $0x10] sm:$0xff] }
 0xbcc   : > { %3997 = vmatprep.mubr.msk.f32.mxu0 %vm4256_vm4, %v4255_v8  ;;  %3996 = vmatpush3.msra.mxu0 %v2726_v41 }
 0xbcd   : > { %4005 = vmatprep.subr.mxu0 %v4255_v8 }
 0xc8b   : > { %v2801_v30 = vpop.f32.mrf.mxu0 }
 0xc8c   : > { %v2805_v31 = vmul.f32 0.35355338, %v2801_v30 }
 0xc8d   : > { %v3994_v32 = vpop.f32.mrf.mxu0 }
 0xc8e   : > { %v2806_v33 = vsel %vm1273_vm6, %v2805_v31, -inf  ;;  %v3680_v32 = vld [vmem:[%s925_s0] ss:$0 sm:$0xff] }
 0xc8f   : > { %2807 = vmax.xlane.f32.xlu0 %v2806_v33 }
 0xd18   : > { %v2808_v34 = vpop.xlane.xlu0 %2807 }
 0xd19   : > { %v2809_v35 = vsub.f32 %v2805_v31, %v2808_v34 }
 0xd1b   : > { %v2810_v36 = vmul.f32 1.442695, %v2809_v35 }
 0xd1d   : > { %4151 = vpow2.f32 %v2810_v36 }
 0xd2a   : > { %v4152_v37 = vpop.eup %4151 }
 0xd2b   : > { %v2812_v38 = vsel %vm1273_vm6, %v4152_v37, 0.0 }
 0xd2c   : > { %2813 = vadd.xlane.f32.xlu1 %v2812_v38 }
 0xdb5   : > { %v2814_v44 = vpop.xlane.xlu1 %2813 }
 0xdb6   : > { %4153 = vrcp.f32 %v2814_v44 }
 0xdc3   : > { %v4154_v45 = vpop.eup %4153 }
 0xdc4   : > { %v2816_v46 = vmul.f32 %v4154_v45, %v4152_v37 }
 0xdc6   : > { %3998 = vmatmul.mubr.msk.f32.vlgmr.msra.gmra.mxu0 %vm1273_vm6, %v2816_v46  ;;  %v3681_v46 = vld [vmem:[%s928_s20] ss:$0 sm:$0xff] }
 0xdc7   : > { %4013 = vmatprep.mubr.msk.f32.mxu0 %vm4256_vm4, %v4255_v8  ;;  %4006 = vmatpush3.msra.mxu0 %v3008_v61 }
 0xdc8   : > { %4007 = vmatprep.subr.mxu0 %v4255_v8 }
 0xe86   : > { %v2886_v47 = vpop.f32.mrf.mxu0 }
 0xe87   : > { %4003 = vmatmul.mubr.msk.f32.vlgmr.msra.gmra.mxu1 %vm1273_vm6, %v2886_v47 }
 0xe88   : > { %v3999_v48 = vpop.f32.mrf.mxu0  ;;  %4048 = vmatprep.mubr.msk.f32.mxu1 %vm4256_vm4, %v4255_v8  ;;  %4017 = vmatpush3.msra.mxu1 %v3105_v0 }
 0xe89   : > { %4018 = vmatprep.subr.mxu1 %v4255_v8  ;;  %v3682_v48 = vld [vmem:[%s931_s4] ss:$0 sm:$0xff] }
 0xe8a   : > { %4019 = vmatpush3.msra.mxu1 %v3104_v1 }
 0xe8b   : > { %4020 = vmatprep.subr.mxu1 %v4255_v8 }
 0xe8c   : > { %4021 = vmatpush3.msra.mxu1 %v3103_v2 }
 0xe8d   : > { %4022 = vmatprep.subr.mxu1 %v4255_v8 }
 0xe8e   : > { %4023 = vmatpush3.msra.mxu1 %v3102_v3 }
 0xe8f   : > { %4024 = vmatprep.subr.mxu1 %v4255_v8 }
 0xe90   : > { %4025 = vmatpush3.msra.mxu1 %v3101_v4 }
 0xe91   : > { %4026 = vmatprep.subr.mxu1 %v4255_v8 }
 0xe92   : > { %4027 = vmatpush3.msra.mxu1 %v3100_v5 }
 0xe93   : > { %4028 = vmatprep.subr.mxu1 %v4255_v8 }
 0xe94   : > { %4029 = vmatpush3.msra.mxu1 %v3099_v6 }
 0xe95   : > { %4030 = vmatprep.subr.mxu1 %v4255_v8 }
 0xe96   : > { %4031 = vmatpush3.msra.mxu1 %v3098_v7 }
 0xe97   : > { %4032 = vmatprep.subr.mxu1 %v4255_v8 }
 0xe98   : > { %4033 = vmatpush3.msra.mxu1 %v3097_v9 }
 0xe99   : > { %4034 = vmatprep.subr.mxu1 %v4255_v8 }
 0xe9a   : > { %4035 = vmatpush3.msra.mxu1 %v3096_v10 }
 0xe9b   : > { %4036 = vmatprep.subr.mxu1 %v4255_v8 }
 0xe9c   : > { %4037 = vmatpush3.msra.mxu1 %v3095_v11 }
 0xe9d   : > { %4038 = vmatprep.subr.mxu1 %v4255_v8 }
 0xe9e   : > { %4039 = vmatpush3.msra.mxu1 %v3094_v13 }
 0xe9f   : > { %4040 = vmatprep.subr.mxu1 %v4255_v8 }
 0xea0   : > { %4041 = vmatpush3.msra.mxu1 %v3093_v14 }
 0xea1   : > { %4042 = vmatprep.subr.mxu1 %v4255_v8 }
 0xea2   : > { %4043 = vmatpush3.msra.mxu1 %v3092_v24 }
 0xea3   : > { %4044 = vmatprep.subr.mxu1 %v4255_v8 }
 0xea4   : > { %4045 = vmatpush3.msra.mxu1 %v3091_v25 }
 0xea5   : > { %4046 = vmatprep.subr.mxu1 %v4255_v8 }
 0xea6   : > { %4047 = vmatpush3.msra.mxu1 %v3090_v26 }
 0xf47   : > { %v2961_v49 = vpop.f32.mrf.mxu1 }
 0xf48   : > { %v2965_v51 = vadd.f32 %v2961_v49, %v2479_v18 }
 0xf49   : > { %v4004_v52 = vpop.f32.mrf.mxu1 }
 0xf4a   : > { %v2973_v53 = vadd.f32 %v3675_v50, %v2965_v51 }
 0xf4c   : > { %v2974_v54 = vadd.f32 %v2973_v53, %v4548_v12  ;;  %v3007_v12 = vld [vmem:[%s4502_s8 + $0x10] sm:$0xff]  ;;  %s5015_s8 = smov (!%p3683_p1), %s5014_s3 }
 0xf4d   : > { %4008 = vmatpush3.msra.mxu0 %v3007_v12 }
 0xf4e   : > { %v2977_v55 = vsel %vm1037_vm5, %v2974_v54, 0.0  ;;  %4009 = vmatprep.subr.mxu0 %v4255_v8 }
 0xf4f   : > { %2978 = vadd.xlane.f32.xlu0 %v2977_v55  ;;  %4010 = vmatpush3.msra.mxu0 %v3006_v62 }
 0xf50   : > { %4011 = vmatprep.subr.mxu0 %v4255_v8 }
 0xf51   : > { %4012 = vmatpush3.msra.mxu0 %v3005_v63 }
 0xfd8   : > { %v2979_v56 = vpop.xlane.xlu0 %2978 }
 0xfd9   : > { %v2981_v57 = vmul.f32 0.03125, %v2979_v56 }
 0xfdb   : > { %v2982_v58 = vsub.f32 %v2974_v54, %v2981_v57 }
 0xfdd   : > { %v2983_v59 = vmul.f32 %v2982_v58, %v2982_v58 }
 0xfdf   : > { %v2984_v60 = vsel %vm1037_vm5, %v2983_v59, 0.0 }
 0xfe0   : > { %2985 = vadd.xlane.f32.xlu1 %v2984_v60 }
0x1069   : > { %v2986_v15 = vpop.xlane.xlu1 %2985 }
0x106a   : > { %v2987_v16 = vmul.f32 0.03125, %v2986_v15 }
0x106c   : > { %v2988_v17 = vadd.f32 1e-05, %v2987_v16 }
0x106e   : > { %4155 = vrsqrt.f32 %v2988_v17 }
0x107b   : > { %v4156_v18 = vpop.eup %4155 }
0x107c   : > { %v2990_v20 = vmul.f32 %v4156_v18, %v2982_v58 }
0x107e   : > { %v2997_v22 = vmul.f32 %v3676_v19, %v2990_v20 }
0x1080   : > { %v3004_v23 = vadd.f32 %v3677_v21, %v2997_v22 }
0x1082   : > { %4014 = vmatmul.mubr.msk.f32.vlgmr.msra.gmra.mxu0 %vm1037_vm5, %v3004_v23 }
0x1142   : > { %v3085_v28 = vpop.f32.mrf.mxu0 }
0x1143   : > { %v3086_v29 = vadd.f32 %v3678_v27, %v3085_v28 }
0x1144   : > { %v4015_v30 = vpop.f32.mrf.mxu0 }
0x1145   : > { %v3089_v31 = vmax.f32 %v3086_v29, 0.0 }
0x1147   : > { %4049 = vmatmul.mubr.f32.vlgmr.msra.gmra.mxu1 %v3089_v31 }
0x1207   : > { %v3179_v33 = vpop.f32.mrf.mxu1 }
0x1208   : > { %v3180_v34 = vadd.f32 %v3680_v32, %v3179_v33 }
0x1209   : > { %v4050_v8 = vpop.f32.mrf.mxu1 }
0x120a   : > { %v3183_v35 = vadd.f32 %v3180_v34, %v3004_v23 }
0x120c   : > { %v3186_v36 = vsel %vm1037_vm5, %v3183_v35, 0.0 }
0x120d   : > { %3187 = vadd.xlane.f32.xlu0 %v3186_v36 }
0x1296   : > { %v3188_v37 = vpop.xlane.xlu0 %3187 }
0x1297   : > { %v3189_v38 = vmul.f32 0.03125, %v3188_v37 }
0x1299   : > { %v3190_v39 = vsub.f32 %v3183_v35, %v3189_v38 }
0x129b   : > { %v3191_v40 = vmul.f32 %v3190_v39, %v3190_v39 }
0x129d   : > { %v3192_v41 = vsel %vm1037_vm5, %v3191_v40, 0.0 }
0x129e   : > { %3193 = vadd.xlane.f32.xlu1 %v3192_v41 }
0x1327   : > { %v3194_v42 = vpop.xlane.xlu1 %3193 }
0x1328   : > { %v3195_v43 = vmul.f32 0.03125, %v3194_v42 }
0x132a   : > { %v3196_v44 = vadd.f32 1e-05, %v3195_v43 }
0x132c   : > { %4157 = vrsqrt.f32 %v3196_v44 }
0x1339   : > { %v4158_v45 = vpop.eup %4157 }
0x133a   : > { %v3198_v47 = vmul.f32 %v4158_v45, %v3190_v39 }
0x133c   : > { %v3205_v49 = vmul.f32 %v3681_v46, %v3198_v47  ;;  %3217 = sbr.rel (%p3683_p1) target bundleno = 5147 (0x141b), region = 112 }
0x133e   : > { %v3212_v50 = vadd.f32 %v3682_v48, %v3205_v49 }
0x1340   : > { %3213 = vst.msk [vmem:[#allocation2] sm:$0xff] %vm1037_vm5, %v3212_v50 }
0x1341   : > { %v3221_v51 = vld [vmem:[%s5014_s3 + $0x18] sm:$0xff]  ;;  %v4257_v52 = vmov 0.0   ;;  %v3220_v53 = vld [vmem:[%s5015_s8 + $0x10] sm:$0xff]  ;;  %vm4258_vm7 = vmmov 0   ;;  %v3219_v54 = vld [vmem:[%s5015_s8 + $0x8] sm:$0xff]  ;;  %vm3302_vm8 = vcmask 130048  }
0x1342   : > { %4051 = vmatprep.subr.mxu0 %v4257_v52  ;;  %4059 = vmatprep.mubr.msk.f32.mxu0 %vm4258_vm7, %v4257_v52  ;;  %v3218_v55 = vld [vmem:[%s5015_s8] sm:$0xff]  ;;  %vm3310_vm9 = vcmask 122880  }
0x1343   : > { %4052 = vmatpush3.msra.mxu0 %v3221_v51  ;;  %v3684_v56 = vld [vmem:[%s5016_s1] ss:$0 sm:$0xff] }
0x1344   : > { %4053 = vmatprep.subr.mxu0 %v4257_v52 }
0x1345   : > { %4054 = vmatpush3.msra.mxu0 %v3220_v53 }
0x1346   : > { %4055 = vmatprep.subr.mxu0 %v4257_v52 }
0x1347   : > { %4056 = vmatpush3.msra.mxu0 %v3219_v54 }
0x1348   : > { %4057 = vmatprep.subr.mxu0 %v4257_v52 }
0x1349   : > { %4058 = vmatpush3.msra.mxu0 %v3218_v55 }
0x134a   : > { %4060 = vmatmul.mubr.msk.f32.vlgmr.msra.gmra.mxu0 %vm1037_vm5, %v3212_v50 }
0x140a   : > { %v3298_v57 = vpop.f32.mrf.mxu0 }
0x140b   : > { %v3299_v58 = vadd.f32 %v3684_v56, %v3298_v57 }
0x140c   : > { %v4061_v59 = vpop.f32.mrf.mxu0 }
0x140d   : > { %v3303_v60 = vsel %vm3302_vm8, %v3299_v58, -inf }
0x140e   : > { %v3304_v61 = vrot.slane %v3303_v60, 4 }
0x1410   : > { %v3305_v12 = vmax.f32 %v3303_v60, %v3304_v61 }
0x1412   : > { %v3306_v62 = vrot.slane %v3305_v12, 2 }
0x1414   : > { %v3307_v63 = vmax.f32 %v3305_v12, %v3306_v62 }
0x1416   : > { %v3308_v0 = vrot.slane %v3307_v63, 1 }
0x1418   : > { %v3309_v1 = vmax.f32 %v3307_v63, %v3308_v0 }
0x141a   : > { %3311 = vst.msk [vmem:[%s4527_s18] sm:$0x1] %vm3310_vm9, %v3309_v1 }
0x141b PF: > { %s5017_s13 = sld [smem:[#allocation9_spill]]  ;;  %s3325_s23 = sshll.u32 %s4527_s18, 4  ;;  %s3326_s23 = int_to_ptr.vmem [resolvable:$true] %s3325_s23 }
0x141c   : > { %s5019_s24 = sld [smem:[#allocation37_spill]]  ;;  %s5020_s27 = sand.u32 1, %s4227_s25  }
0x141d   : > { %s3313_s21 = scalar_lea.sflag [#allocation4], %s5020_s27  ;;  %s4159_s19 = scalar_lea.vmem %s3326_s23, 16 }
0x141e   : > { %p4160_p2 = scmp.ne.s32.totalorder %s3326_s23, %s4159_s19  ;;  %s4259_s3 = smov [#allocation3]  }
0x141f   : > { %s4163_s20 = sshll.u32 %s4259_s3, 4  ;;  %s4164_s20 = int_to_ptr.vmem [resolvable:$false] %s4163_s20 }
0x1420   : > { %p4161_p4 = pnand %p4160_p2, %p4419_p3  ;;  %s4165_s28 = scalar_lea.vmem %s4164_s20, 32 }
0x1421   : > { %s3686_s5 = sshll.u32 %s5017_s13, 4  ;;  %p4166_p6 = scmp.lt.s32.totalorder %s3326_s23, %s4164_s20 }
0x1422   : > { %s3323_s30 = scalar_lea.hbm %s5019_s24, %s3686_s5  ;;  %p4162_p5 = pneg %p4161_p4 }
0x1423   : > { %p4167_p7 = scmp.lt.s32.totalorder %s4165_s28, %s4159_s19 }
0x1425   : > { %p4168_p8 = por %p4167_p7, %p4166_p6 }
0x1427   : > { %p4169_p10 = pnand %p4168_p8, %p4162_p5 }
0x1429   : > { %4172 = shalt.err (!%p4169_p10)
}
0x142a   : > { %s4173_s2 = scalar_lea.hbm %s3323_s30, 16  ;;  %s4177_s26 = scalar_lea.hbm %s5019_s24, 32 }
0x142b   : > { %p4174_p11 = scmp.ne.s32.totalorder %s3323_s30, %s4173_s2  ;;  %p4178_p0 = scmp.lt.s32.totalorder %s3323_s30, %s5019_s24 }
0x142c   : > { %p4179_p1 = scmp.lt.s32.totalorder %s4177_s26, %s4173_s2 }
0x142d   : > { %p4175_p12 = pnand %p4174_p11, %p4419_p3 }
0x142e   : > { %p4180_p2 = por %p4179_p1, %p4178_p0 }
0x142f   : > { %p4176_p13 = pneg %p4175_p12 }
0x1431   : > { %p4181_p4 = pnand %p4180_p2, %p4176_p13 }
0x1433   : > { %4184 = shalt.err (!%p4181_p4)
}
0x1434   : > { %4062 = dma.vmem_to_hbm [thread:$0]  (%p4419_p3), %s3326_s23, 16, %s3323_s30, %s3313_s21  }
0x1435 PF: > { %s5021_s6 = sld [smem:[#allocation12_spill]] }
0x1436   : > { %s5022_s1 = sld [smem:[#allocation6_spill]] }
0x143b   : > { %p4068_p5 = scmp.ge.s32.totalorder %s5021_s6, 2 }
0x143c   : > { %s3337_s5 = sand.u32 1, %s5022_s1  }
0x143d   : > { %p4065_p6 = pnand %p4068_p5, %p4429_p9  ;;  %s3338_s9 = scalar_lea.sflag [#allocation4], %s3337_s5 }
0x143f   : > { %p4066_p7 = pneg %p4065_p6 }
0x1441   : > { %4218 = dma.done.wait (%p4066_p7), %s3338_s9, 16  }
0x1442   : > { %4220 = vsyncadd (%p4066_p7), %s3338_s9, 4294967280  ;;  %s34_s0 = sadd.s32 1, %s5021_s6   ;;  %s5024_s27 = sld [smem:[#allocation7_spill]] }
0x1443   : > { %p31_p8 = scmp.ge.s32.totalorder %s34_s0, 6   ;;  %s5025_s26 = sld [smem:[#allocation17_spill]] }
0x1444   : > { %s5026_s7 = sld [smem:[#allocation10_spill]]  ;;  %s5030_s2 = smov %s4227_s25 }
0x1445   : > { %s5027_s3 = sld [smem:[#allocation11_spill]] }
0x1446   : > { %s5028_s28 = sld [smem:[#allocation13_spill]]  ;;  %33 = sbr.rel (!%p31_p8) target bundleno = 21 (0x15), region = 216 }
0x1447   : > { %s5029_s29 = sld [smem:[#allocation15_spill]] }
0x1448   : > { %s5031_s25 = smov %s5024_s27 }
0x144a   : > { %s5032_s27 = smov %s5026_s7 }
0x144b   :  { %3342 = vsyncpa [#allocation4], 1 }
0x144c   :  { %3344 = vsyncpa [#allocation4 + $0x1], 1 }

</bundles_post_ra>
